<compile_context>
chip_gen: v7x
topology: tpu7x:2x2x1
jax: 0.10.0
libtpu: 0.0.40
codegen_flags: <defaults>
</compile_context>

<pallas_src>
import jax
import jax.numpy as jnp
from jax import lax
from jax.experimental import pallas as pl
from jax.experimental.pallas import tpu as pltpu


def _round_up(x, m):
    return ((x + m - 1) // m) * m


def _lstm_recurrence_kernel(lens_ref, invlen_ref, gx_ref, whh_ref, out_ref,
                            h_sc, c_sc, sum_sc):
    """One (batch-tile, time-chunk) grid step of the LSTM recurrence.

    lens_ref   (B_TILE, 1)               int32  valid length per row
    invlen_ref (B_TILE, 1)               f32    1 / max(len, 1)
    gx_ref     (T_CHUNK, B_TILE, 4*H_pad) f32   precomputed x @ W_ih^T + bias
    whh_ref    (H_pad, 4*H_pad)          bf16   recurrent weights (gate-packed)
    out_ref    (B_TILE, H_pad)           f32    masked-mean output
    h/c/sum scratch (B_TILE, H_pad)      f32    state carried across time chunks
    """
    t_blk = pl.program_id(1)
    t_chunk = gx_ref.shape[0]
    h_pad = h_sc.shape[-1]

    @pl.when(t_blk == 0)
    def _init():
        h_sc[...] = jnp.zeros_like(h_sc)
        c_sc[...] = jnp.zeros_like(c_sc)
        sum_sc[...] = jnp.zeros_like(sum_sc)

    # Hoist loop-invariant loads out of the unrolled time loop.
    lens = lens_ref[...]                       # (B_TILE, 1) int32
    whh = whh_ref[...]                         # (H_pad, 4*H_pad) bf16
    t0 = t_blk * t_chunk

    def step(i, carry):
        h, c, acc = carry
        # Only the recurrent matmul remains on the serialized critical path.
        gates = gx_ref[i] + jnp.dot(h.astype(jnp.bfloat16), whh,
                                    preferred_element_type=jnp.float32)
        # Gate slices are 128-lane aligned (H_pad % 128 == 0) -> pure VPU, no masks.
        i_g = jax.nn.sigmoid(gates[:, 0 * h_pad:1 * h_pad])
        f_g = jax.nn.sigmoid(gates[:, 1 * h_pad:2 * h_pad])
        g_g = jnp.tanh(gates[:, 2 * h_pad:3 * h_pad])
        o_g = jax.nn.sigmoid(gates[:, 3 * h_pad:4 * h_pad])
        c_new = f_g * c + i_g * g_g
        h_new = o_g * jnp.tanh(c_new)
        # packed-sequence semantics: state only advances while t < length[b]
        valid = (t0 + i) < lens                # (B_TILE, 1) bool, int32 compare
        c = jnp.where(valid, c_new, c)
        h = jnp.where(valid, h_new, h)
        acc = acc + jnp.where(valid, h_new, 0.0)
        return h, c, acc

    h, c, acc = lax.fori_loop(0, t_chunk, step,
                              (h_sc[...], c_sc[...], sum_sc[...]),
                              unroll=True)
    h_sc[...] = h
    c_sc[...] = c
    sum_sc[...] = acc

    @pl.when(t_blk == pl.num_programs(1) - 1)
    def _finalize():
        out_ref[...] = sum_sc[...] * invlen_ref[...]


def lstm_mean_forward(tokens_emb, lengths, w_ih, w_hh, b_ih, b_hh,
                      *, t_chunk=8, b_tile=8):
    """tokens_emb: [B, S, D] f32 (batch-first, like PyTorch); lengths: [B] int.
    w_ih: [4H, D], w_hh: [4H, H], b_ih/b_hh: [4H]  (PyTorch nn.LSTM layout).
    Returns rep: [B, H] f32 (the 'mean' merge), matching (self.dropout(rep), None)
    with dropout as identity."""
    B, S, D = tokens_emb.shape
    H = w_hh.shape[1]
    H_pad = _round_up(H, 128)            # lane-aligned gate / output width
    B_pad = _round_up(B, b_tile)
    S_pad = _round_up(S, t_chunk)
    G = 4 * H_pad
    f32 = jnp.float32

    # Gate-packed, lane-aligned weights: gate g occupies cols [g*H_pad, g*H_pad+H).
    def pack_cols(w):                    # [4H, K] -> [K, 4*H_pad]
        K = w.shape[1]
        out = jnp.zeros((K, G), f32)
        for g in range(4):
            out = out.at[:, g * H_pad:g * H_pad + H].set(
                w[g * H:(g + 1) * H, :].T.astype(f32))
        return out

    wih_p = pack_cols(w_ih)                                           # [D, 4*H_pad]
    whh_p = jnp.zeros((H_pad, G), f32).at[:H, :].set(pack_cols(w_hh))  # [H_pad, 4*H_pad]
    bias_full = (b_ih + b_hh).astype(f32)
    bias_p = jnp.zeros((G,), f32)
    for g in range(4):
        bias_p = bias_p.at[g * H_pad:g * H_pad + H].set(
            bias_full[g * H:(g + 1) * H])

    # Time-major, zero-padded input (padded rows/steps are masked by `valid`).
    x_tm = jnp.zeros((S_pad, B_pad, D), f32)
    x_tm = x_tm.at[:S, :B, :].set(
        jnp.transpose(tokens_emb, (1, 0, 2)).astype(f32))

    lens_i = jnp.zeros((B_pad, 1), jnp.int32).at[:B, 0].set(
        lengths.astype(jnp.int32))
    inv_len = 1.0 / jnp.maximum(lens_i, 1).astype(f32)                # guards len==0

    # Hoisted time-parallel input projection: one big bf16 matmul (f32 acc),
    # bias folded in once.  Runs as a single well-shaped XLA matmul.
    gates_x = jnp.einsum(
        "sbd,dg->sbg",
        x_tm.astype(jnp.bfloat16), wih_p.astype(jnp.bfloat16),
        preferred_element_type=jnp.float32) + bias_p[None, None, :]   # [S_pad,B_pad,G]

    whh_bf = whh_p.astype(jnp.bfloat16)   # bf16 weights: half the VMEM footprint

    grid = (B_pad // b_tile, S_pad // t_chunk)

    out = pl.pallas_call(
        _lstm_recurrence_kernel,
        out_shape=jax.ShapeDtypeStruct((B_pad, H_pad), f32),
        grid_spec=pltpu.PrefetchScalarGridSpec(
            num_scalar_prefetch=0,
            grid=grid,
            in_specs=[
                pl.BlockSpec((b_tile, 1), lambda b, t: (b, 0)),           # lengths
                pl.BlockSpec((b_tile, 1), lambda b, t: (b, 0)),           # 1/len
                pl.BlockSpec((t_chunk, b_tile, G), lambda b, t: (t, b, 0)),  # gates_x
                # NOTE: after hoisting, only W_hh remains in the kernel; it is tiny
                # (bf16, H_pad x 4H_pad).  At production H, single-buffer it with
                # pipeline_mode=pl.Buffered(1) or a one-time DMA from pl.ANY.
                pl.BlockSpec((H_pad, G), lambda b, t: (0, 0)),            # W_hh^T
            ],
            out_specs=pl.BlockSpec((b_tile, H_pad), lambda b, t: (b, 0)),
            scratch_shapes=[
                pltpu.VMEM((b_tile, H_pad), f32),   # h state
                pltpu.VMEM((b_tile, H_pad), f32),   # c state
                pltpu.VMEM((b_tile, H_pad), f32),   # masked sum of h
            ],
        ),
        compiler_params=pltpu.CompilerParams(
            dimension_semantics=("parallel", "arbitrary"),
            vmem_limit_bytes=32 * 1024 * 1024,
        ),
    )(lens_i, inv_len, gates_x, whh_bf)

    return out[:B, :H], None


def _reference_jax(tokens_emb, lengths, w_ih, w_hh, b_ih, b_hh):
    """Pure-JAX LSTM + masked mean, mirroring the kernel's bf16-operand /
    f32-accumulate matmul numerics (state and activations in f32)."""
    B, S, D = tokens_emb.shape
    H = w_hh.shape[1]
    bias = (b_ih + b_hh).astype(jnp.float32)
    wih_bf = w_ih.astype(jnp.bfloat16).T        # [D, 4H]
    whh_bf = w_hh.astype(jnp.bfloat16).T        # [H, 4H]
    lens = lengths.astype(jnp.int32)

    def step(carry, xt_t):
        h, c, acc = carry
        x_t, t = xt_t
        gates = (jnp.dot(x_t.astype(jnp.bfloat16), wih_bf,
                         preferred_element_type=jnp.float32)
                 + jnp.dot(h.astype(jnp.bfloat16), whh_bf,
                           preferred_element_type=jnp.float32)
                 + bias)
        i = jax.nn.sigmoid(gates[:, :H])
        f = jax.nn.sigmoid(gates[:, H:2 * H])
        g = jnp.tanh(gates[:, 2 * H:3 * H])
        o = jax.nn.sigmoid(gates[:, 3 * H:])
        c_new = f * c + i * g
        h_new = o * jnp.tanh(c_new)
        valid = (t < lens)[:, None]
        c = jnp.where(valid, c_new, c)
        h = jnp.where(valid, h_new, h)
        acc = acc + jnp.where(valid, h_new, 0.0)
        return (h, c, acc), None

    init = (jnp.zeros((B, H), jnp.float32),
            jnp.zeros((B, H), jnp.float32),
            jnp.zeros((B, H), jnp.float32))
    xs = (jnp.transpose(tokens_emb, (1, 0, 2)).astype(jnp.float32),
          jnp.arange(S, dtype=jnp.int32))
    (_, _, acc), _ = lax.scan(step, init, xs)
    return acc / jnp.maximum(lens, 1).astype(jnp.float32)[:, None]


if __name__ == "__main__":
    # config: word_vec_size=16, mem_size=32, layer=1, brnn=False, merge='mean',
    #         dropout=0.0  ->  hidden_size = 32
    B, S, D, H = 2, 8, 16, 32

    key = jax.random.PRNGKey(0)
    k_x, k_wih, k_whh, k_bih, k_bhh = jax.random.split(key, 5)

    tokens_emb = jax.random.normal(k_x, (B, S, D), dtype=jnp.float32)
    lengths = jnp.array([8, 5], dtype=jnp.int32)   # descending, as pack() expects

    scale = 1.0 / jnp.sqrt(jnp.float32(H))         # PyTorch LSTM init range
    w_ih = jax.random.uniform(k_wih, (4 * H, D), minval=-scale, maxval=scale)
    w_hh = jax.random.uniform(k_whh, (4 * H, H), minval=-scale, maxval=scale)
    b_ih = jax.random.uniform(k_bih, (4 * H,), minval=-scale, maxval=scale)
    b_hh = jax.random.uniform(k_bhh, (4 * H,), minval=-scale, maxval=scale)

    rep, _ = lstm_mean_forward(tokens_emb, lengths, w_ih, w_hh, b_ih, b_hh)
    rep = jax.block_until_ready(rep)

    ref = _reference_jax(tokens_emb, lengths, w_ih, w_hh, b_ih, b_hh)
    assert rep.shape == (B, H)
    # Tolerance accounts for bf16 matmul operands (f32 accumulation) on both sides.
    assert jnp.allclose(rep, ref, rtol=3e-3, atol=3e-3), "mismatch vs reference"

    # TODO(synk): bidirectional (brnn=True), multi-layer, and the 'all'/'last'
    # merge paths are not exercised; dropout is identity (p=0).
    print("KERNEL_OK")
</pallas_src>

<mosaic_0001>
module attributes {stable_mosaic.version = 11 : i64} {
  func.func @_lstm_recurrence_kernel(%arg0: i32, %arg1: i32, %arg2: memref<8x1xi32, #tpu.memory_space<vmem>>, %arg3: memref<8x1xf32, #tpu.memory_space<vmem>>, %arg4: memref<8x8x512xf32, #tpu.memory_space<vmem>>, %arg5: memref<128x512xbf16, #tpu.memory_space<vmem>>, %arg6: memref<8x128xf32, #tpu.memory_space<vmem>>, %arg7: memref<8x128xf32, #tpu.memory_space<vmem>>, %arg8: memref<8x128xf32, #tpu.memory_space<vmem>>, %arg9: memref<8x128xf32, #tpu.memory_space<vmem>>) attributes {dimension_semantics = [#tpu.dimension_semantics<parallel>, #tpu.dimension_semantics<arbitrary>], iteration_bounds = array<i64: 1, 1>, scalar_prefetch = 0 : i64, scratch_operands = 3 : i64, tpu.core_type = #tpu.core_type<tc>, window_params = [{transform_indices = @transform_0, window_bounds = array<i64: 8, 1>}, {transform_indices = @transform_1, window_bounds = array<i64: 8, 1>}, {transform_indices = @transform_2, window_bounds = array<i64: 8, 8, 512>}, {pipeline_mode = #tpu.pipeline_mode<synchronous>, transform_indices = @transform_3, window_bounds = array<i64: 128, 512>}, {transform_indices = @transform_4, window_bounds = array<i64: 8, 128>}]} {
    %c0_i32 = arith.constant 0 : i32
    %0 = arith.cmpi eq, %arg1, %c0_i32 : i32
    %1 = arith.extui %0 : i1 to i32
    %c0_i32_0 = arith.constant 0 : i32
    %2 = arith.cmpi ne, %1, %c0_i32_0 : i32
    scf.if %2 {
      %cst_75 = arith.constant 0.000000e+00 : f32
      %375 = vector.broadcast %cst_75 : f32 to vector<8x128xf32>
      %c0_76 = arith.constant 0 : index
      %c0_77 = arith.constant 0 : index
      %376 = vector.load %arg7[%c0_76, %c0_77] : memref<8x128xf32, #tpu.memory_space<vmem>>, vector<8x128xf32>
      tpu.vector_store %arg7[%c0_76, %c0_77], %375 {strides = array<i32>} : memref<8x128xf32, #tpu.memory_space<vmem>>, vector<8x128xf32>,
      %cst_78 = arith.constant 0.000000e+00 : f32
      %377 = vector.broadcast %cst_78 : f32 to vector<8x128xf32>
      %c0_79 = arith.constant 0 : index
      %c0_80 = arith.constant 0 : index
      %378 = vector.load %arg8[%c0_79, %c0_80] : memref<8x128xf32, #tpu.memory_space<vmem>>, vector<8x128xf32>
      tpu.vector_store %arg8[%c0_79, %c0_80], %377 {strides = array<i32>} : memref<8x128xf32, #tpu.memory_space<vmem>>, vector<8x128xf32>,
      %cst_81 = arith.constant 0.000000e+00 : f32
      %379 = vector.broadcast %cst_81 : f32 to vector<8x128xf32>
      %c0_82 = arith.constant 0 : index
      %c0_83 = arith.constant 0 : index
      %380 = vector.load %arg9[%c0_82, %c0_83] : memref<8x128xf32, #tpu.memory_space<vmem>>, vector<8x128xf32>
      tpu.vector_store %arg9[%c0_82, %c0_83], %379 {strides = array<i32>} : memref<8x128xf32, #tpu.memory_space<vmem>>, vector<8x128xf32>,
    } else {
    }
    %c0 = arith.constant 0 : index
    %c0_1 = arith.constant 0 : index
    %3 = vector.load %arg2[%c0, %c0_1] : memref<8x1xi32, #tpu.memory_space<vmem>>, vector<8x1xi32>
    %c0_2 = arith.constant 0 : index
    %c0_3 = arith.constant 0 : index
    %4 = vector.load %arg5[%c0_2, %c0_3] : memref<128x512xbf16, #tpu.memory_space<vmem>>, vector<128x512xbf16>
    %c8_i32 = arith.constant 8 : i32
    %5 = arith.muli %arg1, %c8_i32 : i32
    %c0_4 = arith.constant 0 : index
    %c0_5 = arith.constant 0 : index
    %6 = vector.load %arg7[%c0_4, %c0_5] : memref<8x128xf32, #tpu.memory_space<vmem>>, vector<8x128xf32>
    %c0_6 = arith.constant 0 : index
    %c0_7 = arith.constant 0 : index
    %7 = vector.load %arg8[%c0_6, %c0_7] : memref<8x128xf32, #tpu.memory_space<vmem>>, vector<8x128xf32>
    %c0_8 = arith.constant 0 : index
    %c0_9 = arith.constant 0 : index
    %8 = vector.load %arg9[%c0_8, %c0_9] : memref<8x128xf32, #tpu.memory_space<vmem>>, vector<8x128xf32>
    %c0_i32_10 = arith.constant 0 : i32
    %9 = arith.index_cast %c0_i32_10 : i32 to index
    %c0_11 = arith.constant 0 : index
    %c0_12 = arith.constant 0 : index
    %10 = vector.load %arg4[%9, %c0_11, %c0_12] : memref<8x8x512xf32, #tpu.memory_space<vmem>>, vector<1x8x512xf32>
    %11 = vector.shape_cast %10 : vector<1x8x512xf32> to vector<8x512xf32>
    %12 = arith.truncf %6 : vector<8x128xf32> to vector<8x128xbf16>
    %cst = arith.constant dense<0.000000e+00> : vector<8x512xf32>
    %13 = tpu.matmul %12, %4, %cst {dimension_numbers = #tpu.dot_dimension_numbers<[1], [0], [0], [1], [0, 0, 1, 1], [], []>} : vector<8x128xbf16>, vector<128x512xbf16>, vector<8x512xf32> -> vector<8x512xf32>
    %14 = arith.addf %11, %13 : vector<8x512xf32>
    %15 = vector.extract_strided_slice %14 {offsets = [0, 0], sizes = [8, 128], strides = [1, 1]} : vector<8x512xf32> to vector<8x128xf32>
    %16 = arith.negf %15 : vector<8x128xf32>
    %17 = math.exp %16 : vector<8x128xf32>
    %cst_13 = arith.constant 1.000000e+00 : f32
    %18 = vector.broadcast %cst_13 : f32 to vector<8x128xf32>
    %19 = arith.addf %18, %17 : vector<8x128xf32>
    %20 = arith.divf %18, %19 : vector<8x128xf32>
    %21 = vector.extract_strided_slice %14 {offsets = [0, 128], sizes = [8, 128], strides = [1, 1]} : vector<8x512xf32> to vector<8x128xf32>
    %22 = arith.negf %21 : vector<8x128xf32>
    %23 = math.exp %22 : vector<8x128xf32>
    %cst_14 = arith.constant 1.000000e+00 : f32
    %24 = vector.broadcast %cst_14 : f32 to vector<8x128xf32>
    %25 = arith.addf %24, %23 : vector<8x128xf32>
    %26 = arith.divf %24, %25 : vector<8x128xf32>
    %27 = vector.extract_strided_slice %14 {offsets = [0, 256], sizes = [8, 128], strides = [1, 1]} : vector<8x512xf32> to vector<8x128xf32>
    %28 = math.tanh %27 : vector<8x128xf32>
    %29 = vector.extract_strided_slice %14 {offsets = [0, 384], sizes = [8, 128], strides = [1, 1]} : vector<8x512xf32> to vector<8x128xf32>
    %30 = arith.negf %29 : vector<8x128xf32>
    %31 = math.exp %30 : vector<8x128xf32>
    %cst_15 = arith.constant 1.000000e+00 : f32
    %32 = vector.broadcast %cst_15 : f32 to vector<8x128xf32>
    %33 = arith.addf %32, %31 : vector<8x128xf32>
    %34 = arith.divf %32, %33 : vector<8x128xf32>
    %35 = arith.mulf %26, %7 : vector<8x128xf32>
    %36 = arith.mulf %20, %28 : vector<8x128xf32>
    %37 = arith.addf %35, %36 : vector<8x128xf32>
    %38 = math.tanh %37 : vector<8x128xf32>
    %39 = arith.mulf %34, %38 : vector<8x128xf32>
    %40 = arith.addi %5, %c0_i32_10 : i32
    %41 = vector.broadcast %40 : i32 to vector<8x1xi32>
    %42 = arith.cmpi slt, %41, %3 : vector<8x1xi32>
    %43 = vector.shape_cast %42 : vector<8x1xi1> to vector<8x1xi1>
    %44 = vector.broadcast %43 : vector<8x1xi1> to vector<8x128xi1>
    %45 = arith.select %44, %37, %7 : vector<8x128xi1>, vector<8x128xf32>
    %46 = vector.shape_cast %42 : vector<8x1xi1> to vector<8x1xi1>
    %47 = vector.broadcast %46 : vector<8x1xi1> to vector<8x128xi1>
    %48 = arith.select %47, %39, %6 : vector<8x128xi1>, vector<8x128xf32>
    %cst_16 = arith.constant 0.000000e+00 : f32
    %49 = vector.shape_cast %42 : vector<8x1xi1> to vector<8x1xi1>
    %50 = vector.broadcast %49 : vector<8x1xi1> to vector<8x128xi1>
    %51 = vector.broadcast %cst_16 : f32 to vector<8x128xf32>
    %52 = arith.select %50, %39, %51 : vector<8x128xi1>, vector<8x128xf32>
    %53 = arith.addf %8, %52 : vector<8x128xf32>
    %c1_i32 = arith.constant 1 : i32
    %54 = arith.index_cast %c1_i32 : i32 to index
    %c0_17 = arith.constant 0 : index
    %c0_18 = arith.constant 0 : index
    %55 = vector.load %arg4[%54, %c0_17, %c0_18] : memref<8x8x512xf32, #tpu.memory_space<vmem>>, vector<1x8x512xf32>
    %56 = vector.shape_cast %55 : vector<1x8x512xf32> to vector<8x512xf32>
    %57 = arith.truncf %48 : vector<8x128xf32> to vector<8x128xbf16>
    %cst_19 = arith.constant dense<0.000000e+00> : vector<8x512xf32>
    %58 = tpu.matmul %57, %4, %cst_19 {dimension_numbers = #tpu.dot_dimension_numbers<[1], [0], [0], [1], [0, 0, 1, 1], [], []>} : vector<8x128xbf16>, vector<128x512xbf16>, vector<8x512xf32> -> vector<8x512xf32>
    %59 = arith.addf %56, %58 : vector<8x512xf32>
    %60 = vector.extract_strided_slice %59 {offsets = [0, 0], sizes = [8, 128], strides = [1, 1]} : vector<8x512xf32> to vector<8x128xf32>
    %61 = arith.negf %60 : vector<8x128xf32>
    %62 = math.exp %61 : vector<8x128xf32>
    %cst_20 = arith.constant 1.000000e+00 : f32
    %63 = vector.broadcast %cst_20 : f32 to vector<8x128xf32>
    %64 = arith.addf %63, %62 : vector<8x128xf32>
    %65 = arith.divf %63, %64 : vector<8x128xf32>
    %66 = vector.extract_strided_slice %59 {offsets = [0, 128], sizes = [8, 128], strides = [1, 1]} : vector<8x512xf32> to vector<8x128xf32>
    %67 = arith.negf %66 : vector<8x128xf32>
    %68 = math.exp %67 : vector<8x128xf32>
    %cst_21 = arith.constant 1.000000e+00 : f32
    %69 = vector.broadcast %cst_21 : f32 to vector<8x128xf32>
    %70 = arith.addf %69, %68 : vector<8x128xf32>
    %71 = arith.divf %69, %70 : vector<8x128xf32>
    %72 = vector.extract_strided_slice %59 {offsets = [0, 256], sizes = [8, 128], strides = [1, 1]} : vector<8x512xf32> to vector<8x128xf32>
    %73 = math.tanh %72 : vector<8x128xf32>
    %74 = vector.extract_strided_slice %59 {offsets = [0, 384], sizes = [8, 128], strides = [1, 1]} : vector<8x512xf32> to vector<8x128xf32>
    %75 = arith.negf %74 : vector<8x128xf32>
    %76 = math.exp %75 : vector<8x128xf32>
    %cst_22 = arith.constant 1.000000e+00 : f32
    %77 = vector.broadcast %cst_22 : f32 to vector<8x128xf32>
    %78 = arith.addf %77, %76 : vector<8x128xf32>
    %79 = arith.divf %77, %78 : vector<8x128xf32>
    %80 = arith.mulf %71, %45 : vector<8x128xf32>
    %81 = arith.mulf %65, %73 : vector<8x128xf32>
    %82 = arith.addf %80, %81 : vector<8x128xf32>
    %83 = math.tanh %82 : vector<8x128xf32>
    %84 = arith.mulf %79, %83 : vector<8x128xf32>
    %85 = arith.addi %5, %c1_i32 : i32
    %86 = vector.broadcast %85 : i32 to vector<8x1xi32>
    %87 = arith.cmpi slt, %86, %3 : vector<8x1xi32>
    %88 = vector.shape_cast %87 : vector<8x1xi1> to vector<8x1xi1>
    %89 = vector.broadcast %88 : vector<8x1xi1> to vector<8x128xi1>
    %90 = arith.select %89, %82, %45 : vector<8x128xi1>, vector<8x128xf32>
    %91 = vector.shape_cast %87 : vector<8x1xi1> to vector<8x1xi1>
    %92 = vector.broadcast %91 : vector<8x1xi1> to vector<8x128xi1>
    %93 = arith.select %92, %84, %48 : vector<8x128xi1>, vector<8x128xf32>
    %cst_23 = arith.constant 0.000000e+00 : f32
    %94 = vector.shape_cast %87 : vector<8x1xi1> to vector<8x1xi1>
    %95 = vector.broadcast %94 : vector<8x1xi1> to vector<8x128xi1>
    %96 = vector.broadcast %cst_23 : f32 to vector<8x128xf32>
    %97 = arith.select %95, %84, %96 : vector<8x128xi1>, vector<8x128xf32>
    %98 = arith.addf %53, %97 : vector<8x128xf32>
    %c2_i32 = arith.constant 2 : i32
    %99 = arith.index_cast %c2_i32 : i32 to index
    %c0_24 = arith.constant 0 : index
    %c0_25 = arith.constant 0 : index
    %100 = vector.load %arg4[%99, %c0_24, %c0_25] : memref<8x8x512xf32, #tpu.memory_space<vmem>>, vector<1x8x512xf32>
    %101 = vector.shape_cast %100 : vector<1x8x512xf32> to vector<8x512xf32>
    %102 = arith.truncf %93 : vector<8x128xf32> to vector<8x128xbf16>
    %cst_26 = arith.constant dense<0.000000e+00> : vector<8x512xf32>
    %103 = tpu.matmul %102, %4, %cst_26 {dimension_numbers = #tpu.dot_dimension_numbers<[1], [0], [0], [1], [0, 0, 1, 1], [], []>} : vector<8x128xbf16>, vector<128x512xbf16>, vector<8x512xf32> -> vector<8x512xf32>
    %104 = arith.addf %101, %103 : vector<8x512xf32>
    %105 = vector.extract_strided_slice %104 {offsets = [0, 0], sizes = [8, 128], strides = [1, 1]} : vector<8x512xf32> to vector<8x128xf32>
    %106 = arith.negf %105 : vector<8x128xf32>
    %107 = math.exp %106 : vector<8x128xf32>
    %cst_27 = arith.constant 1.000000e+00 : f32
    %108 = vector.broadcast %cst_27 : f32 to vector<8x128xf32>
    %109 = arith.addf %108, %107 : vector<8x128xf32>
    %110 = arith.divf %108, %109 : vector<8x128xf32>
    %111 = vector.extract_strided_slice %104 {offsets = [0, 128], sizes = [8, 128], strides = [1, 1]} : vector<8x512xf32> to vector<8x128xf32>
    %112 = arith.negf %111 : vector<8x128xf32>
    %113 = math.exp %112 : vector<8x128xf32>
    %cst_28 = arith.constant 1.000000e+00 : f32
    %114 = vector.broadcast %cst_28 : f32 to vector<8x128xf32>
    %115 = arith.addf %114, %113 : vector<8x128xf32>
    %116 = arith.divf %114, %115 : vector<8x128xf32>
    %117 = vector.extract_strided_slice %104 {offsets = [0, 256], sizes = [8, 128], strides = [1, 1]} : vector<8x512xf32> to vector<8x128xf32>
    %118 = math.tanh %117 : vector<8x128xf32>
    %119 = vector.extract_strided_slice %104 {offsets = [0, 384], sizes = [8, 128], strides = [1, 1]} : vector<8x512xf32> to vector<8x128xf32>
    %120 = arith.negf %119 : vector<8x128xf32>
    %121 = math.exp %120 : vector<8x128xf32>
    %cst_29 = arith.constant 1.000000e+00 : f32
    %122 = vector.broadcast %cst_29 : f32 to vector<8x128xf32>
    %123 = arith.addf %122, %121 : vector<8x128xf32>
    %124 = arith.divf %122, %123 : vector<8x128xf32>
    %125 = arith.mulf %116, %90 : vector<8x128xf32>
    %126 = arith.mulf %110, %118 : vector<8x128xf32>
    %127 = arith.addf %125, %126 : vector<8x128xf32>
    %128 = math.tanh %127 : vector<8x128xf32>
    %129 = arith.mulf %124, %128 : vector<8x128xf32>
    %130 = arith.addi %5, %c2_i32 : i32
    %131 = vector.broadcast %130 : i32 to vector<8x1xi32>
    %132 = arith.cmpi slt, %131, %3 : vector<8x1xi32>
    %133 = vector.shape_cast %132 : vector<8x1xi1> to vector<8x1xi1>
    %134 = vector.broadcast %133 : vector<8x1xi1> to vector<8x128xi1>
    %135 = arith.select %134, %127, %90 : vector<8x128xi1>, vector<8x128xf32>
    %136 = vector.shape_cast %132 : vector<8x1xi1> to vector<8x1xi1>
    %137 = vector.broadcast %136 : vector<8x1xi1> to vector<8x128xi1>
    %138 = arith.select %137, %129, %93 : vector<8x128xi1>, vector<8x128xf32>
    %cst_30 = arith.constant 0.000000e+00 : f32
    %139 = vector.shape_cast %132 : vector<8x1xi1> to vector<8x1xi1>
    %140 = vector.broadcast %139 : vector<8x1xi1> to vector<8x128xi1>
    %141 = vector.broadcast %cst_30 : f32 to vector<8x128xf32>
    %142 = arith.select %140, %129, %141 : vector<8x128xi1>, vector<8x128xf32>
    %143 = arith.addf %98, %142 : vector<8x128xf32>
    %c3_i32 = arith.constant 3 : i32
    %144 = arith.index_cast %c3_i32 : i32 to index
    %c0_31 = arith.constant 0 : index
    %c0_32 = arith.constant 0 : index
    %145 = vector.load %arg4[%144, %c0_31, %c0_32] : memref<8x8x512xf32, #tpu.memory_space<vmem>>, vector<1x8x512xf32>
    %146 = vector.shape_cast %145 : vector<1x8x512xf32> to vector<8x512xf32>
    %147 = arith.truncf %138 : vector<8x128xf32> to vector<8x128xbf16>
    %cst_33 = arith.constant dense<0.000000e+00> : vector<8x512xf32>
    %148 = tpu.matmul %147, %4, %cst_33 {dimension_numbers = #tpu.dot_dimension_numbers<[1], [0], [0], [1], [0, 0, 1, 1], [], []>} : vector<8x128xbf16>, vector<128x512xbf16>, vector<8x512xf32> -> vector<8x512xf32>
    %149 = arith.addf %146, %148 : vector<8x512xf32>
    %150 = vector.extract_strided_slice %149 {offsets = [0, 0], sizes = [8, 128], strides = [1, 1]} : vector<8x512xf32> to vector<8x128xf32>
    %151 = arith.negf %150 : vector<8x128xf32>
    %152 = math.exp %151 : vector<8x128xf32>
    %cst_34 = arith.constant 1.000000e+00 : f32
    %153 = vector.broadcast %cst_34 : f32 to vector<8x128xf32>
    %154 = arith.addf %153, %152 : vector<8x128xf32>
    %155 = arith.divf %153, %154 : vector<8x128xf32>
    %156 = vector.extract_strided_slice %149 {offsets = [0, 128], sizes = [8, 128], strides = [1, 1]} : vector<8x512xf32> to vector<8x128xf32>
    %157 = arith.negf %156 : vector<8x128xf32>
    %158 = math.exp %157 : vector<8x128xf32>
    %cst_35 = arith.constant 1.000000e+00 : f32
    %159 = vector.broadcast %cst_35 : f32 to vector<8x128xf32>
    %160 = arith.addf %159, %158 : vector<8x128xf32>
    %161 = arith.divf %159, %160 : vector<8x128xf32>
    %162 = vector.extract_strided_slice %149 {offsets = [0, 256], sizes = [8, 128], strides = [1, 1]} : vector<8x512xf32> to vector<8x128xf32>
    %163 = math.tanh %162 : vector<8x128xf32>
    %164 = vector.extract_strided_slice %149 {offsets = [0, 384], sizes = [8, 128], strides = [1, 1]} : vector<8x512xf32> to vector<8x128xf32>
    %165 = arith.negf %164 : vector<8x128xf32>
    %166 = math.exp %165 : vector<8x128xf32>
    %cst_36 = arith.constant 1.000000e+00 : f32
    %167 = vector.broadcast %cst_36 : f32 to vector<8x128xf32>
    %168 = arith.addf %167, %166 : vector<8x128xf32>
    %169 = arith.divf %167, %168 : vector<8x128xf32>
    %170 = arith.mulf %161, %135 : vector<8x128xf32>
    %171 = arith.mulf %155, %163 : vector<8x128xf32>
    %172 = arith.addf %170, %171 : vector<8x128xf32>
    %173 = math.tanh %172 : vector<8x128xf32>
    %174 = arith.mulf %169, %173 : vector<8x128xf32>
    %175 = arith.addi %5, %c3_i32 : i32
    %176 = vector.broadcast %175 : i32 to vector<8x1xi32>
    %177 = arith.cmpi slt, %176, %3 : vector<8x1xi32>
    %178 = vector.shape_cast %177 : vector<8x1xi1> to vector<8x1xi1>
    %179 = vector.broadcast %178 : vector<8x1xi1> to vector<8x128xi1>
    %180 = arith.select %179, %172, %135 : vector<8x128xi1>, vector<8x128xf32>
    %181 = vector.shape_cast %177 : vector<8x1xi1> to vector<8x1xi1>
    %182 = vector.broadcast %181 : vector<8x1xi1> to vector<8x128xi1>
    %183 = arith.select %182, %174, %138 : vector<8x128xi1>, vector<8x128xf32>
    %cst_37 = arith.constant 0.000000e+00 : f32
    %184 = vector.shape_cast %177 : vector<8x1xi1> to vector<8x1xi1>
    %185 = vector.broadcast %184 : vector<8x1xi1> to vector<8x128xi1>
    %186 = vector.broadcast %cst_37 : f32 to vector<8x128xf32>
    %187 = arith.select %185, %174, %186 : vector<8x128xi1>, vector<8x128xf32>
    %188 = arith.addf %143, %187 : vector<8x128xf32>
    %c4_i32 = arith.constant 4 : i32
    %189 = arith.index_cast %c4_i32 : i32 to index
    %c0_38 = arith.constant 0 : index
    %c0_39 = arith.constant 0 : index
    %190 = vector.load %arg4[%189, %c0_38, %c0_39] : memref<8x8x512xf32, #tpu.memory_space<vmem>>, vector<1x8x512xf32>
    %191 = vector.shape_cast %190 : vector<1x8x512xf32> to vector<8x512xf32>
    %192 = arith.truncf %183 : vector<8x128xf32> to vector<8x128xbf16>
    %cst_40 = arith.constant dense<0.000000e+00> : vector<8x512xf32>
    %193 = tpu.matmul %192, %4, %cst_40 {dimension_numbers = #tpu.dot_dimension_numbers<[1], [0], [0], [1], [0, 0, 1, 1], [], []>} : vector<8x128xbf16>, vector<128x512xbf16>, vector<8x512xf32> -> vector<8x512xf32>
    %194 = arith.addf %191, %193 : vector<8x512xf32>
    %195 = vector.extract_strided_slice %194 {offsets = [0, 0], sizes = [8, 128], strides = [1, 1]} : vector<8x512xf32> to vector<8x128xf32>
    %196 = arith.negf %195 : vector<8x128xf32>
    %197 = math.exp %196 : vector<8x128xf32>
    %cst_41 = arith.constant 1.000000e+00 : f32
    %198 = vector.broadcast %cst_41 : f32 to vector<8x128xf32>
    %199 = arith.addf %198, %197 : vector<8x128xf32>
    %200 = arith.divf %198, %199 : vector<8x128xf32>
    %201 = vector.extract_strided_slice %194 {offsets = [0, 128], sizes = [8, 128], strides = [1, 1]} : vector<8x512xf32> to vector<8x128xf32>
    %202 = arith.negf %201 : vector<8x128xf32>
    %203 = math.exp %202 : vector<8x128xf32>
    %cst_42 = arith.constant 1.000000e+00 : f32
    %204 = vector.broadcast %cst_42 : f32 to vector<8x128xf32>
    %205 = arith.addf %204, %203 : vector<8x128xf32>
    %206 = arith.divf %204, %205 : vector<8x128xf32>
    %207 = vector.extract_strided_slice %194 {offsets = [0, 256], sizes = [8, 128], strides = [1, 1]} : vector<8x512xf32> to vector<8x128xf32>
    %208 = math.tanh %207 : vector<8x128xf32>
    %209 = vector.extract_strided_slice %194 {offsets = [0, 384], sizes = [8, 128], strides = [1, 1]} : vector<8x512xf32> to vector<8x128xf32>
    %210 = arith.negf %209 : vector<8x128xf32>
    %211 = math.exp %210 : vector<8x128xf32>
    %cst_43 = arith.constant 1.000000e+00 : f32
    %212 = vector.broadcast %cst_43 : f32 to vector<8x128xf32>
    %213 = arith.addf %212, %211 : vector<8x128xf32>
    %214 = arith.divf %212, %213 : vector<8x128xf32>
    %215 = arith.mulf %206, %180 : vector<8x128xf32>
    %216 = arith.mulf %200, %208 : vector<8x128xf32>
    %217 = arith.addf %215, %216 : vector<8x128xf32>
    %218 = math.tanh %217 : vector<8x128xf32>
    %219 = arith.mulf %214, %218 : vector<8x128xf32>
    %220 = arith.addi %5, %c4_i32 : i32
    %221 = vector.broadcast %220 : i32 to vector<8x1xi32>
    %222 = arith.cmpi slt, %221, %3 : vector<8x1xi32>
    %223 = vector.shape_cast %222 : vector<8x1xi1> to vector<8x1xi1>
    %224 = vector.broadcast %223 : vector<8x1xi1> to vector<8x128xi1>
    %225 = arith.select %224, %217, %180 : vector<8x128xi1>, vector<8x128xf32>
    %226 = vector.shape_cast %222 : vector<8x1xi1> to vector<8x1xi1>
    %227 = vector.broadcast %226 : vector<8x1xi1> to vector<8x128xi1>
    %228 = arith.select %227, %219, %183 : vector<8x128xi1>, vector<8x128xf32>
    %cst_44 = arith.constant 0.000000e+00 : f32
    %229 = vector.shape_cast %222 : vector<8x1xi1> to vector<8x1xi1>
    %230 = vector.broadcast %229 : vector<8x1xi1> to vector<8x128xi1>
    %231 = vector.broadcast %cst_44 : f32 to vector<8x128xf32>
    %232 = arith.select %230, %219, %231 : vector<8x128xi1>, vector<8x128xf32>
    %233 = arith.addf %188, %232 : vector<8x128xf32>
    %c5_i32 = arith.constant 5 : i32
    %234 = arith.index_cast %c5_i32 : i32 to index
    %c0_45 = arith.constant 0 : index
    %c0_46 = arith.constant 0 : index
    %235 = vector.load %arg4[%234, %c0_45, %c0_46] : memref<8x8x512xf32, #tpu.memory_space<vmem>>, vector<1x8x512xf32>
    %236 = vector.shape_cast %235 : vector<1x8x512xf32> to vector<8x512xf32>
    %237 = arith.truncf %228 : vector<8x128xf32> to vector<8x128xbf16>
    %cst_47 = arith.constant dense<0.000000e+00> : vector<8x512xf32>
    %238 = tpu.matmul %237, %4, %cst_47 {dimension_numbers = #tpu.dot_dimension_numbers<[1], [0], [0], [1], [0, 0, 1, 1], [], []>} : vector<8x128xbf16>, vector<128x512xbf16>, vector<8x512xf32> -> vector<8x512xf32>
    %239 = arith.addf %236, %238 : vector<8x512xf32>
    %240 = vector.extract_strided_slice %239 {offsets = [0, 0], sizes = [8, 128], strides = [1, 1]} : vector<8x512xf32> to vector<8x128xf32>
    %241 = arith.negf %240 : vector<8x128xf32>
    %242 = math.exp %241 : vector<8x128xf32>
    %cst_48 = arith.constant 1.000000e+00 : f32
    %243 = vector.broadcast %cst_48 : f32 to vector<8x128xf32>
    %244 = arith.addf %243, %242 : vector<8x128xf32>
    %245 = arith.divf %243, %244 : vector<8x128xf32>
    %246 = vector.extract_strided_slice %239 {offsets = [0, 128], sizes = [8, 128], strides = [1, 1]} : vector<8x512xf32> to vector<8x128xf32>
    %247 = arith.negf %246 : vector<8x128xf32>
    %248 = math.exp %247 : vector<8x128xf32>
    %cst_49 = arith.constant 1.000000e+00 : f32
    %249 = vector.broadcast %cst_49 : f32 to vector<8x128xf32>
    %250 = arith.addf %249, %248 : vector<8x128xf32>
    %251 = arith.divf %249, %250 : vector<8x128xf32>
    %252 = vector.extract_strided_slice %239 {offsets = [0, 256], sizes = [8, 128], strides = [1, 1]} : vector<8x512xf32> to vector<8x128xf32>
    %253 = math.tanh %252 : vector<8x128xf32>
    %254 = vector.extract_strided_slice %239 {offsets = [0, 384], sizes = [8, 128], strides = [1, 1]} : vector<8x512xf32> to vector<8x128xf32>
    %255 = arith.negf %254 : vector<8x128xf32>
    %256 = math.exp %255 : vector<8x128xf32>
    %cst_50 = arith.constant 1.000000e+00 : f32
    %257 = vector.broadcast %cst_50 : f32 to vector<8x128xf32>
    %258 = arith.addf %257, %256 : vector<8x128xf32>
    %259 = arith.divf %257, %258 : vector<8x128xf32>
    %260 = arith.mulf %251, %225 : vector<8x128xf32>
    %261 = arith.mulf %245, %253 : vector<8x128xf32>
    %262 = arith.addf %260, %261 : vector<8x128xf32>
    %263 = math.tanh %262 : vector<8x128xf32>
    %264 = arith.mulf %259, %263 : vector<8x128xf32>
    %265 = arith.addi %5, %c5_i32 : i32
    %266 = vector.broadcast %265 : i32 to vector<8x1xi32>
    %267 = arith.cmpi slt, %266, %3 : vector<8x1xi32>
    %268 = vector.shape_cast %267 : vector<8x1xi1> to vector<8x1xi1>
    %269 = vector.broadcast %268 : vector<8x1xi1> to vector<8x128xi1>
    %270 = arith.select %269, %262, %225 : vector<8x128xi1>, vector<8x128xf32>
    %271 = vector.shape_cast %267 : vector<8x1xi1> to vector<8x1xi1>
    %272 = vector.broadcast %271 : vector<8x1xi1> to vector<8x128xi1>
    %273 = arith.select %272, %264, %228 : vector<8x128xi1>, vector<8x128xf32>
    %cst_51 = arith.constant 0.000000e+00 : f32
    %274 = vector.shape_cast %267 : vector<8x1xi1> to vector<8x1xi1>
    %275 = vector.broadcast %274 : vector<8x1xi1> to vector<8x128xi1>
    %276 = vector.broadcast %cst_51 : f32 to vector<8x128xf32>
    %277 = arith.select %275, %264, %276 : vector<8x128xi1>, vector<8x128xf32>
    %278 = arith.addf %233, %277 : vector<8x128xf32>
    %c6_i32 = arith.constant 6 : i32
    %279 = arith.index_cast %c6_i32 : i32 to index
    %c0_52 = arith.constant 0 : index
    %c0_53 = arith.constant 0 : index
    %280 = vector.load %arg4[%279, %c0_52, %c0_53] : memref<8x8x512xf32, #tpu.memory_space<vmem>>, vector<1x8x512xf32>
    %281 = vector.shape_cast %280 : vector<1x8x512xf32> to vector<8x512xf32>
    %282 = arith.truncf %273 : vector<8x128xf32> to vector<8x128xbf16>
    %cst_54 = arith.constant dense<0.000000e+00> : vector<8x512xf32>
    %283 = tpu.matmul %282, %4, %cst_54 {dimension_numbers = #tpu.dot_dimension_numbers<[1], [0], [0], [1], [0, 0, 1, 1], [], []>} : vector<8x128xbf16>, vector<128x512xbf16>, vector<8x512xf32> -> vector<8x512xf32>
    %284 = arith.addf %281, %283 : vector<8x512xf32>
    %285 = vector.extract_strided_slice %284 {offsets = [0, 0], sizes = [8, 128], strides = [1, 1]} : vector<8x512xf32> to vector<8x128xf32>
    %286 = arith.negf %285 : vector<8x128xf32>
    %287 = math.exp %286 : vector<8x128xf32>
    %cst_55 = arith.constant 1.000000e+00 : f32
    %288 = vector.broadcast %cst_55 : f32 to vector<8x128xf32>
    %289 = arith.addf %288, %287 : vector<8x128xf32>
    %290 = arith.divf %288, %289 : vector<8x128xf32>
    %291 = vector.extract_strided_slice %284 {offsets = [0, 128], sizes = [8, 128], strides = [1, 1]} : vector<8x512xf32> to vector<8x128xf32>
    %292 = arith.negf %291 : vector<8x128xf32>
    %293 = math.exp %292 : vector<8x128xf32>
    %cst_56 = arith.constant 1.000000e+00 : f32
    %294 = vector.broadcast %cst_56 : f32 to vector<8x128xf32>
    %295 = arith.addf %294, %293 : vector<8x128xf32>
    %296 = arith.divf %294, %295 : vector<8x128xf32>
    %297 = vector.extract_strided_slice %284 {offsets = [0, 256], sizes = [8, 128], strides = [1, 1]} : vector<8x512xf32> to vector<8x128xf32>
    %298 = math.tanh %297 : vector<8x128xf32>
    %299 = vector.extract_strided_slice %284 {offsets = [0, 384], sizes = [8, 128], strides = [1, 1]} : vector<8x512xf32> to vector<8x128xf32>
    %300 = arith.negf %299 : vector<8x128xf32>
    %301 = math.exp %300 : vector<8x128xf32>
    %cst_57 = arith.constant 1.000000e+00 : f32
    %302 = vector.broadcast %cst_57 : f32 to vector<8x128xf32>
    %303 = arith.addf %302, %301 : vector<8x128xf32>
    %304 = arith.divf %302, %303 : vector<8x128xf32>
    %305 = arith.mulf %296, %270 : vector<8x128xf32>
    %306 = arith.mulf %290, %298 : vector<8x128xf32>
    %307 = arith.addf %305, %306 : vector<8x128xf32>
    %308 = math.tanh %307 : vector<8x128xf32>
    %309 = arith.mulf %304, %308 : vector<8x128xf32>
    %310 = arith.addi %5, %c6_i32 : i32
    %311 = vector.broadcast %310 : i32 to vector<8x1xi32>
    %312 = arith.cmpi slt, %311, %3 : vector<8x1xi32>
    %313 = vector.shape_cast %312 : vector<8x1xi1> to vector<8x1xi1>
    %314 = vector.broadcast %313 : vector<8x1xi1> to vector<8x128xi1>
    %315 = arith.select %314, %307, %270 : vector<8x128xi1>, vector<8x128xf32>
    %316 = vector.shape_cast %312 : vector<8x1xi1> to vector<8x1xi1>
    %317 = vector.broadcast %316 : vector<8x1xi1> to vector<8x128xi1>
    %318 = arith.select %317, %309, %273 : vector<8x128xi1>, vector<8x128xf32>
    %cst_58 = arith.constant 0.000000e+00 : f32
    %319 = vector.shape_cast %312 : vector<8x1xi1> to vector<8x1xi1>
    %320 = vector.broadcast %319 : vector<8x1xi1> to vector<8x128xi1>
    %321 = vector.broadcast %cst_58 : f32 to vector<8x128xf32>
    %322 = arith.select %320, %309, %321 : vector<8x128xi1>, vector<8x128xf32>
    %323 = arith.addf %278, %322 : vector<8x128xf32>
    %c7_i32 = arith.constant 7 : i32
    %324 = arith.index_cast %c7_i32 : i32 to index
    %c0_59 = arith.constant 0 : index
    %c0_60 = arith.constant 0 : index
    %325 = vector.load %arg4[%324, %c0_59, %c0_60] : memref<8x8x512xf32, #tpu.memory_space<vmem>>, vector<1x8x512xf32>
    %326 = vector.shape_cast %325 : vector<1x8x512xf32> to vector<8x512xf32>
    %327 = arith.truncf %318 : vector<8x128xf32> to vector<8x128xbf16>
    %cst_61 = arith.constant dense<0.000000e+00> : vector<8x512xf32>
    %328 = tpu.matmul %327, %4, %cst_61 {dimension_numbers = #tpu.dot_dimension_numbers<[1], [0], [0], [1], [0, 0, 1, 1], [], []>} : vector<8x128xbf16>, vector<128x512xbf16>, vector<8x512xf32> -> vector<8x512xf32>
    %329 = arith.addf %326, %328 : vector<8x512xf32>
    %330 = vector.extract_strided_slice %329 {offsets = [0, 0], sizes = [8, 128], strides = [1, 1]} : vector<8x512xf32> to vector<8x128xf32>
    %331 = arith.negf %330 : vector<8x128xf32>
    %332 = math.exp %331 : vector<8x128xf32>
    %cst_62 = arith.constant 1.000000e+00 : f32
    %333 = vector.broadcast %cst_62 : f32 to vector<8x128xf32>
    %334 = arith.addf %333, %332 : vector<8x128xf32>
    %335 = arith.divf %333, %334 : vector<8x128xf32>
    %336 = vector.extract_strided_slice %329 {offsets = [0, 128], sizes = [8, 128], strides = [1, 1]} : vector<8x512xf32> to vector<8x128xf32>
    %337 = arith.negf %336 : vector<8x128xf32>
    %338 = math.exp %337 : vector<8x128xf32>
    %cst_63 = arith.constant 1.000000e+00 : f32
    %339 = vector.broadcast %cst_63 : f32 to vector<8x128xf32>
    %340 = arith.addf %339, %338 : vector<8x128xf32>
    %341 = arith.divf %339, %340 : vector<8x128xf32>
    %342 = vector.extract_strided_slice %329 {offsets = [0, 256], sizes = [8, 128], strides = [1, 1]} : vector<8x512xf32> to vector<8x128xf32>
    %343 = math.tanh %342 : vector<8x128xf32>
    %344 = vector.extract_strided_slice %329 {offsets = [0, 384], sizes = [8, 128], strides = [1, 1]} : vector<8x512xf32> to vector<8x128xf32>
    %345 = arith.negf %344 : vector<8x128xf32>
    %346 = math.exp %345 : vector<8x128xf32>
    %cst_64 = arith.constant 1.000000e+00 : f32
    %347 = vector.broadcast %cst_64 : f32 to vector<8x128xf32>
    %348 = arith.addf %347, %346 : vector<8x128xf32>
    %349 = arith.divf %347, %348 : vector<8x128xf32>
    %350 = arith.mulf %341, %315 : vector<8x128xf32>
    %351 = arith.mulf %335, %343 : vector<8x128xf32>
    %352 = arith.addf %350, %351 : vector<8x128xf32>
    %353 = math.tanh %352 : vector<8x128xf32>
    %354 = arith.mulf %349, %353 : vector<8x128xf32>
    %355 = arith.addi %5, %c7_i32 : i32
    %356 = vector.broadcast %355 : i32 to vector<8x1xi32>
    %357 = arith.cmpi slt, %356, %3 : vector<8x1xi32>
    %358 = vector.shape_cast %357 : vector<8x1xi1> to vector<8x1xi1>
    %359 = vector.broadcast %358 : vector<8x1xi1> to vector<8x128xi1>
    %360 = arith.select %359, %352, %315 : vector<8x128xi1>, vector<8x128xf32>
    %361 = vector.shape_cast %357 : vector<8x1xi1> to vector<8x1xi1>
    %362 = vector.broadcast %361 : vector<8x1xi1> to vector<8x128xi1>
    %363 = arith.select %362, %354, %318 : vector<8x128xi1>, vector<8x128xf32>
    %cst_65 = arith.constant 0.000000e+00 : f32
    %364 = vector.shape_cast %357 : vector<8x1xi1> to vector<8x1xi1>
    %365 = vector.broadcast %364 : vector<8x1xi1> to vector<8x128xi1>
    %366 = vector.broadcast %cst_65 : f32 to vector<8x128xf32>
    %367 = arith.select %365, %354, %366 : vector<8x128xi1>, vector<8x128xf32>
    %368 = arith.addf %323, %367 : vector<8x128xf32>
    %c8_i32_66 = arith.constant 8 : i32
    %c0_67 = arith.constant 0 : index
    %c0_68 = arith.constant 0 : index
    %369 = vector.load %arg7[%c0_67, %c0_68] : memref<8x128xf32, #tpu.memory_space<vmem>>, vector<8x128xf32>
    tpu.vector_store %arg7[%c0_67, %c0_68], %363 {strides = array<i32>} : memref<8x128xf32, #tpu.memory_space<vmem>>, vector<8x128xf32>,
    %c0_69 = arith.constant 0 : index
    %c0_70 = arith.constant 0 : index
    %370 = vector.load %arg8[%c0_69, %c0_70] : memref<8x128xf32, #tpu.memory_space<vmem>>, vector<8x128xf32>
    tpu.vector_store %arg8[%c0_69, %c0_70], %360 {strides = array<i32>} : memref<8x128xf32, #tpu.memory_space<vmem>>, vector<8x128xf32>,
    %c0_71 = arith.constant 0 : index
    %c0_72 = arith.constant 0 : index
    %371 = vector.load %arg9[%c0_71, %c0_72] : memref<8x128xf32, #tpu.memory_space<vmem>>, vector<8x128xf32>
    tpu.vector_store %arg9[%c0_71, %c0_72], %368 {strides = array<i32>} : memref<8x128xf32, #tpu.memory_space<vmem>>, vector<8x128xf32>,
    %c0_i32_73 = arith.constant 0 : i32
    %372 = arith.cmpi eq, %arg1, %c0_i32_73 : i32
    %373 = arith.extui %372 : i1 to i32
    %c0_i32_74 = arith.constant 0 : i32
    %374 = arith.cmpi ne, %373, %c0_i32_74 : i32
    scf.if %374 {
      %c0_75 = arith.constant 0 : index
      %c0_76 = arith.constant 0 : index
      %375 = vector.load %arg9[%c0_75, %c0_76] : memref<8x128xf32, #tpu.memory_space<vmem>>, vector<8x128xf32>
      %c0_77 = arith.constant 0 : index
      %c0_78 = arith.constant 0 : index
      %376 = vector.load %arg3[%c0_77, %c0_78] : memref<8x1xf32, #tpu.memory_space<vmem>>, vector<8x1xf32>
      %377 = vector.broadcast %376 : vector<8x1xf32> to vector<8x128xf32>
      %378 = arith.mulf %375, %377 : vector<8x128xf32>
      %c0_79 = arith.constant 0 : index
      %c0_80 = arith.constant 0 : index
      %379 = vector.load %arg6[%c0_79, %c0_80] : memref<8x128xf32, #tpu.memory_space<vmem>>, vector<8x128xf32>
      tpu.vector_store %arg6[%c0_79, %c0_80], %378 {strides = array<i32>} : memref<8x128xf32, #tpu.memory_space<vmem>>, vector<8x128xf32>,
    } else {
    }
    return
  }
  func.func @transform_0(%arg0: i32, %arg1: i32) -> (i32, i32) {
    %c0_i32 = arith.constant 0 : i32
    %c0_i32_0 = arith.constant 0 : i32
    return %arg0, %c0_i32 : i32, i32
  }
  func.func @transform_1(%arg0: i32, %arg1: i32) -> (i32, i32) {
    %c0_i32 = arith.constant 0 : i32
    %c0_i32_0 = arith.constant 0 : i32
    return %arg0, %c0_i32 : i32, i32
  }
  func.func @transform_2(%arg0: i32, %arg1: i32) -> (i32, i32, i32) {
    %c0_i32 = arith.constant 0 : i32
    %c0_i32_0 = arith.constant 0 : i32
    return %arg1, %arg0, %c0_i32 : i32, i32, i32
  }
  func.func @transform_3(%arg0: i32, %arg1: i32) -> (i32, i32) {
    %c0_i32 = arith.constant 0 : i32
    %c0_i32_0 = arith.constant 0 : i32
    %c0_i32_1 = arith.constant 0 : i32
    return %c0_i32, %c0_i32_0 : i32, i32
  }
  func.func @transform_4(%arg0: i32, %arg1: i32) -> (i32, i32) {
    %c0_i32 = arith.constant 0 : i32
    %c0_i32_0 = arith.constant 0 : i32
    return %arg0, %c0_i32 : i32, i32
  }
}

</mosaic_0001>

<bundles_post_ra>
// kernel: tpu_custom_call.1
= control target key start
LH: loop header
LB: loop body
LE: loop exit
PB: predicated region body
PF: predicated region fallthrough
CT: control target
= control target key end

     0   :  { %9 = vsyncpa [#allocation6], 0  ;;  %s2192_s0 = inlined_call_operand.vmem [shape: s32[8,1], index: 0, kind: input, shape index: {}]   ;;  %s2193_s1 = inlined_call_operand.vmem [shape: f32[8,1], index: 1, kind: input, shape index: {}]   ;;  %s2194_s2 = inlined_call_operand.hbm [shape: f32[8,8,512], index: 2, kind: input, shape index: {}]   ;;  %s2195_s3 = inlined_call_operand.hbm [shape: bf16[128,512], index: 3, kind: input, shape index: {}]   ;;  %s2196_s4 = inlined_call_operand.hbm [shape: f32[8,128], index: 4, kind: output, shape index: {}]  }
   0x1   :  { %10 = vsyncpa [#allocation9], 0 }
   0x2   :  { %11 = vsyncpa [#allocation7], 0  ;;  %s1665_s15 = smov [#allocation5]   ;;  %s1593_s19 = scalar_lea.hbm %s2194_s2, 4096 }
   0x3   :  { %s21_s16 = sshll.u32 %s1665_s15, 4  ;;  %p1594_p0 = scmp.ne.s32.totalorder %s2194_s2, %s1593_s19  ;;  %s22_s16 = int_to_ptr.vmem [resolvable:$true] %s21_s16 }
   0x4   :  { %p1597_p1 = scmp.lt.u32.totalorder %s1593_s19, %s2194_s2 }
   0x6   :  { %p1599_p2 = pnand %p1597_p1, %p1594_p0 }
   0x8   :  { %1602 = shalt.err (!%p1599_p2)
}
   0x9   :  { %s1603_s24 = scalar_lea.vmem %s22_s16, 4096  ;;  %p1608_p4 = scmp.lt.s32.totalorder %s22_s16, %s22_s16 }
   0xa   :  { %p1604_p3 = scmp.ne.s32.totalorder %s22_s16, %s1603_s24  ;;  %p1609_p5 = scmp.lt.s32.totalorder %s1603_s24, %s1603_s24 }
   0xc   :  { %p1610_p6 = por %p1609_p5, %p1608_p4 }
   0xe   :  { %p1611_p7 = pnand %p1610_p6, %p1604_p3 }
  0x10   :  { %1614 = shalt.err (!%p1611_p7)
}
  0x11   :  { %s1666_s25 = smov 512   ;;  %s1667_s26 = smov 32  }
  0x12   :  { %27 = dma.hbm_to_vmem [thread:$0]  %s2194_s2, 4096, %s22_s16, [#allocation6], %s1666_s25, %s1666_s25, %s1667_s26  }
  0x13   :  { %s1668_s29 = smov [#allocation8]   ;;  %s1615_s7 = scalar_lea.hbm %s2195_s3, 4096 }
  0x14   :  { %s33_s30 = sshll.u32 %s1668_s29, 4  ;;  %p1616_p8 = scmp.ne.s32.totalorder %s2195_s3, %s1615_s7  ;;  %s34_s30 = int_to_ptr.vmem [resolvable:$true] %s33_s30 }
  0x15   :  { %p1619_p9 = scmp.lt.u32.totalorder %s1615_s7, %s2195_s3 }
  0x17   :  { %p1621_p10 = pnand %p1619_p9, %p1616_p8 }
  0x19   :  { %1624 = shalt.err (!%p1621_p10)
}
  0x1a   :  { %s1625_s12 = scalar_lea.vmem %s34_s30, 4096  ;;  %p1630_p12 = scmp.lt.s32.totalorder %s34_s30, %s34_s30 }
  0x1b   :  { %p1626_p11 = scmp.ne.s32.totalorder %s34_s30, %s1625_s12  ;;  %p1631_p13 = scmp.lt.s32.totalorder %s1625_s12, %s1625_s12 }
  0x1d   :  { %p1632_p0 = por %p1631_p13, %p1630_p12 }
  0x1f   :  { %p1633_p1 = pnand %p1632_p0, %p1626_p11 }
  0x21   :  { %1636 = shalt.err (!%p1633_p1)
}
  0x22   :  { %s1669_s2 = smov 256   ;;  %s1670_s13 = smov 16  }
  0x23   :  { %39 = dma.hbm_to_vmem [thread:$0]  %s2195_s3, 4096, %s34_s30, [#allocation9], %s1669_s2, %s1669_s2, %s1670_s13  }
  0x24   :  { %1659 = dma.done.wait [#allocation6], 4096  }
  0x25   :  { %1660 = vsyncadd [#allocation6], 4294963200 }
  0x26   :  { %1661 = dma.done.wait [#allocation9], 4096  }
  0x27   :  { %1662 = vsyncadd [#allocation9], 4294963200  ;;  %v1671_v0 = vmov 0   ;;  %v1727_v1 = vld [vmem:[#allocation8 + $0x4] ss:$16 sps:$4 sm:$0xff]   ;;  %v1798_v25 = vld [vmem:[%s2192_s0] sm:$0xff] }
  0x28   :  { %288 = vmatprep.mubr.bf16.mxu0 %v1671_v0  ;;  %329 = vmatprep.mubr.bf16.mxu1 %v1671_v0  ;;  %v1729_v2 = vld [vmem:[#allocation8] ss:$16 sps:$4 sm:$0xff]   ;;  %v1732_v3 = vld [vmem:[#allocation8 + $0x24] ss:$16 sps:$4 sm:$0xff]   ;;  %v1740_v6 = vld [vmem:[#allocation8 + $0xc] ss:$16 sps:$4 sm:$0xff]  }
  0x29   :  { %1383 = vset.pattern.permute.xlu0 %v1671_v0  ;;  %1384 = vset.pattern.permute.xlu1 %v1671_v0  ;;  %v1735_v4 = vld [vmem:[#allocation8 + $0x20] ss:$16 sps:$4 sm:$0xff]   ;;  %v1738_v5 = vld [vmem:[#allocation8 + $0x44] ss:$16 sps:$4 sm:$0xff]   ;;  %v1742_v7 = vld [vmem:[#allocation8 + $0x8] ss:$16 sps:$4 sm:$0xff]  }
  0x2a   :  { %256 = vmatprep.subr.bf16.mxu0 %v1727_v1  ;;  %v1745_v8 = vld [vmem:[#allocation8 + $0x40] ss:$16 sps:$4 sm:$0xff]   ;;  %297 = vmatprep.subr.bf16.mxu1 %v1740_v6  ;;  %v1749_v9 = vld [vmem:[#allocation8 + $0x64] ss:$16 sps:$4 sm:$0xff]   ;;  %v1752_v10 = vld [vmem:[#allocation8 + $0x2c] ss:$16 sps:$4 sm:$0xff]  }
  0x2b   :  { %257 = vmatpush1.bf16.msra.mxu0 %v1729_v2  ;;  %298 = vmatpush1.bf16.msra.mxu1 %v1742_v7  ;;  %v1754_v11 = vld [vmem:[#allocation8 + $0x28] ss:$16 sps:$4 sm:$0xff]   ;;  %v1758_v12 = vld [vmem:[#allocation8 + $0x60] ss:$16 sps:$4 sm:$0xff]   ;;  %v1760_v13 = vld [vmem:[#allocation8 + $0x84] ss:$16 sps:$4 sm:$0xff]  }
  0x2c   :  { %258 = vmatprep.subr.bf16.mxu0 %v1732_v3  ;;  %299 = vmatprep.subr.bf16.mxu1 %v1752_v10  ;;  %v1762_v14 = vld [vmem:[#allocation8 + $0x4c] ss:$16 sps:$4 sm:$0xff]   ;;  %v1766_v15 = vld [vmem:[#allocation8 + $0x48] ss:$16 sps:$4 sm:$0xff]   ;;  %v1772_v17 = vld [vmem:[#allocation8 + $0x80] ss:$16 sps:$4 sm:$0xff]  }
  0x2d   :  { %v1769_v16 = vld [vmem:[#allocation8 + $0x6c] ss:$16 sps:$4 sm:$0xff]   ;;  %v1775_v18 = vld [vmem:[#allocation8 + $0xa4] ss:$16 sps:$4 sm:$0xff]   ;;  %v1778_v19 = vld [vmem:[#allocation8 + $0x68] ss:$16 sps:$4 sm:$0xff]  }
  0x2e   :  { %v1781_v20 = vld [vmem:[#allocation8 + $0x8c] ss:$16 sps:$4 sm:$0xff]   ;;  %v1784_v21 = vld [vmem:[#allocation8 + $0xa0] ss:$16 sps:$4 sm:$0xff]   ;;  %v1786_v22 = vld [vmem:[#allocation8 + $0xc4] ss:$16 sps:$4 sm:$0xff]  }
  0x2f   :  { %259 = vmatpush1.bf16.msra.mxu0 %v1735_v4  ;;  %300 = vmatpush1.bf16.msra.mxu1 %v1754_v11  ;;  %v1790_v23 = vld [vmem:[#allocation8 + $0x88] ss:$16 sps:$4 sm:$0xff]   ;;  %v1793_v24 = vld [vmem:[#allocation8 + $0xac] ss:$16 sps:$4 sm:$0xff]   ;;  %vm1339_vm0 = vcmp.gt.s32.totalorder %v1798_v25, 0  ;;  %vm1343_vm1 = vcmp.gt.s32.totalorder %v1798_v25, 1 }
  0x30   :  { %260 = vmatprep.subr.bf16.mxu0 %v1738_v5  ;;  %301 = vmatprep.subr.bf16.mxu1 %v1762_v14  ;;  %v1802_v26 = vld [vmem:[#allocation8 + $0xc0] ss:$16 sps:$4 sm:$0xff]   ;;  %v368_v27 = vsel %vm1339_vm0, 1, %v1671_v0  ;;  %v1807_v28 = vld [vmem:[#allocation8 + $0xe4] ss:$16 sps:$4 sm:$0xff]   ;;  %v496_v31 = vsel %vm1343_vm1, 1, %v1671_v0 }
  0x31   :  { %v1810_v29 = vld [vmem:[#allocation8 + $0xa8] ss:$16 sps:$4 sm:$0xff]   ;;  %v1813_v30 = vld [vmem:[#allocation8 + $0xcc] ss:$16 sps:$4 sm:$0xff]   ;;  %370 = vperm.xlu0 %1383, %v368_v27   ;;  %v1817_v32 = vld [vmem:[#allocation8 + $0xe0] ss:$16 sps:$4 sm:$0xff]  }
  0x32   :  { %vm1355_vm2 = vcmp.gt.s32.totalorder %v1798_v25, 4  ;;  %v1822_v33 = vld [vmem:[#allocation8 + $0xc8] ss:$16 sps:$4 sm:$0xff]   ;;  %v1825_v34 = vld [vmem:[#allocation8 + $0xec] ss:$16 sps:$4 sm:$0xff]   ;;  %vm1363_vm3 = vcmp.gt.s32.totalorder %v1798_v25, 6 }
  0x33   :  { %261 = vmatpush1.bf16.msra.mxu0 %v1745_v8  ;;  %302 = vmatpush1.bf16.msra.mxu1 %v1766_v15  ;;  %v880_v35 = vsel %vm1355_vm2, 1, %v1671_v0  ;;  %v1831_v36 = vld [vmem:[#allocation8 + $0xe8] ss:$16 sps:$4 sm:$0xff]   ;;  %v1672_v37 = vmov 0.0|0.0   ;;  %v1136_v38 = vsel %vm1363_vm3, 1, %v1671_v0  ;;  %v91_v40 = vld [vmem:[#allocation5] sm:$0xff] }
  0x34   :  { %262 = vmatprep.subr.bf16.mxu0 %v1749_v9  ;;  %303 = vmatprep.subr.bf16.mxu1 %v1769_v16  ;;  %v1280_v39 = vld [vmem:[%s2193_s1] sm:$0xff]  ;;  %v92_v41 = vld [vmem:[#allocation5 + $0x8] sm:$0xff]  ;;  %v93_v56 = vld [vmem:[#allocation5 + $0x10] sm:$0xff]  ;;  %vm1347_vm6 = vcmp.gt.s32.totalorder %v1798_v25, 2  ;;  %vm1351_vm7 = vcmp.gt.s32.totalorder %v1798_v25, 3  ;;  %vm1359_vm8 = vcmp.gt.s32.totalorder %v1798_v25, 5 }
  0x35   :  { %498 = vperm.xlu0 %1383, %v496_v31   ;;  %v94_v50 = vld [vmem:[#allocation5 + $0x18] sm:$0xff]  ;;  %vm1367_vm9 = vcmp.gt.s32.totalorder %v1798_v25, 7  ;;  %s1673_s1 = smov [#allocation10]  }
  0x36   :  { %v381_v25 = vld [vmem:[#allocation5 + $0x38] sm:$0xff]  ;;  %s1294_s18 = sshll.u32 %s1673_s1, 4  ;;  %s1295_s18 = int_to_ptr.vmem [resolvable:$true] %s1294_s18 }
  0x37   :  { %263 = vmatpush1.bf16.msra.mxu0 %v1758_v12  ;;  %304 = vmatpush1.bf16.msra.mxu1 %v1778_v19  ;;  %s1637_s19 = scalar_lea.vmem %s1295_s18, 128  ;;  %p1642_p3 = scmp.lt.s32.totalorder %s1295_s18, %s1295_s18 }
  0x38   :  { %264 = vmatprep.subr.bf16.mxu0 %v1760_v13  ;;  %305 = vmatprep.subr.bf16.mxu1 %v1781_v20  ;;  %p1638_p2 = scmp.ne.s32.totalorder %s1295_s18, %s1637_s19  ;;  %p1643_p4 = scmp.lt.s32.totalorder %s1637_s19, %s1637_s19 }
  0x39   :  { %882 = vperm.xlu0 %1383, %v880_v35  }
  0x3a   :  { %p1644_p5 = por %p1643_p4, %p1642_p3 }
  0x3b   :  { %265 = vmatpush1.bf16.msra.mxu0 %v1772_v17  ;;  %306 = vmatpush1.bf16.msra.mxu1 %v1790_v23 }
  0x3c   :  { %266 = vmatprep.subr.bf16.mxu0 %v1775_v18  ;;  %307 = vmatprep.subr.bf16.mxu1 %v1793_v24  ;;  %p1645_p6 = pnand %p1644_p5, %p1638_p2 }
  0x3d   :  { %1138 = vperm.xlu0 %1383, %v1136_v38  }
  0x3f   :  { %267 = vmatpush1.bf16.msra.mxu0 %v1784_v21  ;;  %308 = vmatpush1.bf16.msra.mxu1 %v1810_v29 }
  0x40   :  { %268 = vmatprep.subr.bf16.mxu0 %v1786_v22  ;;  %309 = vmatprep.subr.bf16.mxu1 %v1813_v30 }
  0x41   :  { %1283 = vperm.xlu0 %1383, %v1280_v39  }
  0x43   :  { %269 = vmatpush1.bf16.msra.mxu0 %v1802_v26  ;;  %310 = vmatpush1.bf16.msra.mxu1 %v1822_v33 }
  0x44   :  { %270 = vmatprep.subr.bf16.mxu0 %v1807_v28  ;;  %311 = vmatprep.subr.bf16.mxu1 %v1825_v34 }
  0x47   :  { %271 = vmatpush1.bf16.msra.mxu0 %v1817_v32  ;;  %312 = vmatpush1.bf16.msra.mxu1 %v1831_v36 }
  0x48   :  { %383 = vmatprep.subr.bf16.mxu0 %v1727_v1  ;;  %424 = vmatprep.subr.bf16.mxu1 %v1740_v6 }
  0x4a   :  { %289 = vmatmul.mubr.bf16.vlgmr.msra.gmra.mrb[0].mxu0 %v1672_v37  ;;  %330 = vmatmul.mubr.bf16.vlgmr.msra.gmra.mrb[0].mxu1 %v1672_v37 }
  0x4b   :  { %384 = vmatpush1.bf16.msra.mxu0 %v1729_v2  ;;  %415 = vmatprep.mubr.bf16.mxu0 %v1671_v0 }
  0x4c   :  { %385 = vmatprep.subr.bf16.mxu0 %v1732_v3  ;;  %425 = vmatpush1.bf16.msra.mxu1 %v1742_v7 }
  0x4d   :  { %426 = vmatprep.subr.bf16.mxu1 %v1752_v10  ;;  %456 = vmatprep.mubr.bf16.mxu1 %v1671_v0 }
  0x4f   :  { %386 = vmatpush1.bf16.msra.mxu0 %v1735_v4 }
  0x50   :  { %387 = vmatprep.subr.bf16.mxu0 %v1738_v5  ;;  %427 = vmatpush1.bf16.msra.mxu1 %v1754_v11 }
  0x51   :  { %428 = vmatprep.subr.bf16.mxu1 %v1762_v14 }
  0x53   :  { %388 = vmatpush1.bf16.msra.mxu0 %v1745_v8 }
  0x54   :  { %389 = vmatprep.subr.bf16.mxu0 %v1749_v9  ;;  %429 = vmatpush1.bf16.msra.mxu1 %v1766_v15 }
  0x55   :  { %430 = vmatprep.subr.bf16.mxu1 %v1769_v16 }
  0x57   :  { %390 = vmatpush1.bf16.msra.mxu0 %v1758_v12 }
  0x58   :  { %391 = vmatprep.subr.bf16.mxu0 %v1760_v13  ;;  %431 = vmatpush1.bf16.msra.mxu1 %v1778_v19 }
  0x59   :  { %432 = vmatprep.subr.bf16.mxu1 %v1781_v20 }
  0x5b   :  { %392 = vmatpush1.bf16.msra.mxu0 %v1772_v17 }
  0x5c   :  { %393 = vmatprep.subr.bf16.mxu0 %v1775_v18  ;;  %433 = vmatpush1.bf16.msra.mxu1 %v1790_v23 }
  0x5d   :  { %434 = vmatprep.subr.bf16.mxu1 %v1793_v24 }
  0x5f   :  { %394 = vmatpush1.bf16.msra.mxu0 %v1784_v21 }
  0x60   :  { %395 = vmatprep.subr.bf16.mxu0 %v1786_v22  ;;  %435 = vmatpush1.bf16.msra.mxu1 %v1810_v29 }
  0x61   :  { %436 = vmatprep.subr.bf16.mxu1 %v1813_v30 }
  0x63   :  { %396 = vmatpush1.bf16.msra.mxu0 %v1802_v26 }
  0x64   :  { %397 = vmatprep.subr.bf16.mxu0 %v1807_v28  ;;  %437 = vmatpush1.bf16.msra.mxu1 %v1822_v33 }
  0x65   :  { %438 = vmatprep.subr.bf16.mxu1 %v1825_v34 }
  0x67   :  { %398 = vmatpush1.bf16.msra.mxu0 %v1817_v32 }
  0x68   :  { %511 = vmatprep.subr.bf16.mxu0 %v1727_v1  ;;  %439 = vmatpush1.bf16.msra.mxu1 %v1831_v36 }
  0x69   :  { %552 = vmatprep.subr.bf16.mxu1 %v1740_v6 }
 0x11d   :  { %v290_v42 = vpop.f32.mrb[0].mxu0  ;;  %v331_v51 = vpop.f32.mrb[0].mxu1 }
 0x11e   :  { %v338_v43 = vadd.f32 %v290_v42, %v91_v40  ;;  %v292_v44 = vpop.f32.mrb[1].mxu0  ;;  %v333_v52 = vpop.f32.mrb[1].mxu1  ;;  %v340_v58 = vadd.f32 %v331_v51, %v93_v56  ;;  %v379_v51 = vld [vmem:[#allocation5 + $0x28] sm:$0xff] }
 0x11f   :  { %v339_v45 = vadd.f32 %v292_v44, %v92_v41  ;;  %v294_v46 = vpop.f32.mrb[2].mxu0  ;;  %v341_v53 = vadd.f32 %v333_v52, %v94_v50  ;;  %v335_v54 = vpop.f32.mrb[2].mxu1  ;;  %v378_v50 = vld [vmem:[#allocation5 + $0x20] sm:$0xff] }
 0x120   :  { %v1336_v47 = vmul.f32 -1.442695, %v338_v43  ;;  %v295_v48 = vpop.f32.mrb[3].mxu0  ;;  %v336_v55 = vpop.f32.mrb[3].mxu1  ;;  %v624_v46 = vsel %vm1347_vm6, 1, %v1671_v0 }
 0x121   :  { %v1337_v49 = vmul.f32 -1.442695, %v339_v45  ;;  %v1338_v57 = vmul.f32 -1.442695, %v341_v53  ;;  %v1878_v43 = vpop.permute.xlu0 %370  ;;  %626 = vperm.xlu1 %1384, %v624_v46   ;;  %v1008_v48 = vsel %vm1359_vm8, 1, %v1671_v0 }
 0x122   :  { %1433 = vpow2.f32 %v1336_v47  ;;  %vm372_vm4 = vcmp.eq.s32.totalorder %v1878_v43, 1  ;;  %v752_v47 = vsel %vm1351_vm7, 1, %v1671_v0  ;;  %v506_v43 = vld [vmem:[#allocation5 + $0x40] sm:$0xff] }
 0x123   :  { %1435 = vpow2.f32 %v1337_v49  ;;  %vm1368_vm5 = vmpackc.low %vm372_vm4, %vm372_vm4  ;;  %v1264_v49 = vsel %vm1367_vm9, 1, %v1671_v0 }
 0x124   :  { %1437 = vpow2.f32 %v1338_v57 }
 0x125   :  { %1439 = vtanh.f32 %v340_v58  ;;  %754 = vperm.xlu1 %1384, %v752_v47  }
 0x129   :  { %1010 = vperm.xlu1 %1384, %v1008_v48  }
 0x12c   :  { %v1434_v59 = vpop.eup %1433 }
 0x12d   :  { %v1436_v60 = vpop.eup %1435  ;;  %v345_v61 = vadd.f32 1.0, %v1434_v59  ;;  %1266 = vperm.xlu1 %1384, %v1264_v49  }
 0x12e   :  { %v351_v62 = vadd.f32 1.0, %v1436_v60  ;;  %v1438_v63 = vpop.eup %1437 }
 0x12f   :  { %1441 = vrcp.f32 %v345_v61  ;;  %v1440_v27 = vpop.eup %1439  ;;  %v358_v35 = vadd.f32 1.0, %v1438_v63 }
 0x130   :  { %1443 = vrcp.f32 %v351_v62 }
 0x131   :  { %1445 = vrcp.f32 %v358_v35 }
 0x139   :  { %v1442_v31 = vpop.eup %1441 }
 0x13a   :  { %v1444_v37 = vpop.eup %1443  ;;  %v362_v38 = vmul.f32 %v1442_v31, %v1440_v27  ;;  %v380_v31 = vld [vmem:[#allocation5 + $0x30] sm:$0xff] }
 0x13b   :  { %v361_v39 = vmul.f32 0.0, %v1444_v37  ;;  %v1446_v41 = vpop.eup %1445 }
 0x13d   :  { %v1875_v40 = vadd.f32 %v362_v38, %v361_v39 }
 0x13f   :  { %1447 = vtanh.f32 %v1875_v40  ;;  %v373_v49 = vsel %vm372_vm4, %v1875_v40, 0.0 }
 0x149   :  { %v1448_v42 = vpop.eup %1447 }
 0x14a   :  { %v1880_v44 = vmul.f32 %v1448_v42, %v1446_v41 }
 0x14c   :  { %v1369_v45 = vpack.c.bf16 %v1880_v44, %v1880_v44 }
 0x14e   :  { %1370 = vmatmul.mubr.msk.bf16.vlgmr.msra.gmra.mrb[4].mxu0 %vm1368_vm5, %v1369_v45  ;;  %1373 = vmatmul.mubr.msk.bf16.vlgmr.msra.gmra.mrb[4].mxu1 %vm1368_vm5, %v1369_v45 }
 0x14f   :  { %512 = vmatpush1.bf16.msra.mxu0 %v1729_v2  ;;  %553 = vmatpush1.bf16.msra.mxu1 %v1742_v7 }
 0x150   :  { %513 = vmatprep.subr.bf16.mxu0 %v1732_v3  ;;  %554 = vmatprep.subr.bf16.mxu1 %v1752_v10 }
 0x151   :  { %543 = vmatprep.mubr.bf16.mxu0 %v1671_v0  ;;  %584 = vmatprep.mubr.bf16.mxu1 %v1671_v0 }
 0x153   :  { %514 = vmatpush1.bf16.msra.mxu0 %v1735_v4  ;;  %555 = vmatpush1.bf16.msra.mxu1 %v1754_v11 }
 0x154   :  { %515 = vmatprep.subr.bf16.mxu0 %v1738_v5  ;;  %556 = vmatprep.subr.bf16.mxu1 %v1762_v14 }
 0x157   :  { %516 = vmatpush1.bf16.msra.mxu0 %v1745_v8  ;;  %557 = vmatpush1.bf16.msra.mxu1 %v1766_v15 }
 0x158   :  { %517 = vmatprep.subr.bf16.mxu0 %v1749_v9  ;;  %558 = vmatprep.subr.bf16.mxu1 %v1769_v16 }
 0x15b   :  { %518 = vmatpush1.bf16.msra.mxu0 %v1758_v12  ;;  %559 = vmatpush1.bf16.msra.mxu1 %v1778_v19 }
 0x15c   :  { %519 = vmatprep.subr.bf16.mxu0 %v1760_v13  ;;  %560 = vmatprep.subr.bf16.mxu1 %v1781_v20 }
 0x15f   :  { %520 = vmatpush1.bf16.msra.mxu0 %v1772_v17  ;;  %561 = vmatpush1.bf16.msra.mxu1 %v1790_v23 }
 0x160   :  { %521 = vmatprep.subr.bf16.mxu0 %v1775_v18  ;;  %562 = vmatprep.subr.bf16.mxu1 %v1793_v24 }
 0x163   :  { %522 = vmatpush1.bf16.msra.mxu0 %v1784_v21  ;;  %563 = vmatpush1.bf16.msra.mxu1 %v1810_v29 }
 0x164   :  { %523 = vmatprep.subr.bf16.mxu0 %v1786_v22  ;;  %564 = vmatprep.subr.bf16.mxu1 %v1813_v30 }
 0x167   :  { %524 = vmatpush1.bf16.msra.mxu0 %v1802_v26  ;;  %565 = vmatpush1.bf16.msra.mxu1 %v1822_v33 }
 0x168   :  { %525 = vmatprep.subr.bf16.mxu0 %v1807_v28  ;;  %566 = vmatprep.subr.bf16.mxu1 %v1825_v34 }
 0x16b   :  { %526 = vmatpush1.bf16.msra.mxu0 %v1817_v32  ;;  %567 = vmatpush1.bf16.msra.mxu1 %v1831_v36 }
 0x16c   :  { %639 = vmatprep.subr.bf16.mxu0 %v1727_v1  ;;  %680 = vmatprep.subr.bf16.mxu1 %v1740_v6 }
 0x221   :  { %v417_v52 = vpop.f32.mrb[4].mxu0  ;;  %v458_v53 = vpop.f32.mrb[4].mxu1 }
 0x222   :  { %v465_v54 = vadd.f32 %v417_v52, %v378_v50  ;;  %v419_v55 = vpop.f32.mrb[5].mxu0  ;;  %v460_v56 = vpop.f32.mrb[5].mxu1  ;;  %v467_v37 = vadd.f32 %v458_v53, %v380_v31 }
 0x223   :  { %v466_v57 = vadd.f32 %v419_v55, %v379_v51  ;;  %v421_v58 = vpop.f32.mrb[6].mxu0  ;;  %v462_v59 = vpop.f32.mrb[6].mxu1  ;;  %v468_v27 = vadd.f32 %v460_v56, %v381_v25 }
 0x224   :  { %v1340_v60 = vmul.f32 -1.442695, %v465_v54  ;;  %v422_v61 = vpop.f32.mrb[7].mxu0  ;;  %v463_v62 = vpop.f32.mrb[7].mxu1  ;;  %v374_v59 = vsel %vm372_vm4, %v1880_v44, 0.0  ;;  %v507_v44 = vld [vmem:[#allocation5 + $0x48] sm:$0xff] }
 0x225   :  { %v1341_v63 = vmul.f32 -1.442695, %v466_v57  ;;  %v1342_v35 = vmul.f32 -1.442695, %v468_v27  ;;  %v499_v53 = vpop.permute.xlu0 %498 }
 0x226   :  { %1449 = vpow2.f32 %v1340_v60  ;;  %vm500_vm10 = vcmp.eq.s32.totalorder %v499_v53, 1 }
 0x227   :  { %1451 = vpow2.f32 %v1341_v63 }
 0x228   :  { %1453 = vpow2.f32 %v1342_v35 }
 0x229   :  { %1455 = vtanh.f32 %v467_v37 }
 0x230   :  { %v1450_v38 = vpop.eup %1449 }
 0x231   :  { %v1452_v39 = vpop.eup %1451  ;;  %v472_v41 = vadd.f32 1.0, %v1450_v38 }
 0x232   :  { %v478_v42 = vadd.f32 1.0, %v1452_v39  ;;  %v1454_v45 = vpop.eup %1453 }
 0x233   :  { %1457 = vrcp.f32 %v472_v41  ;;  %v1456_v46 = vpop.eup %1455  ;;  %v485_v51 = vadd.f32 1.0, %v1454_v45 }
 0x234   :  { %1459 = vrcp.f32 %v478_v42 }
 0x235   :  { %1461 = vrcp.f32 %v485_v51 }
 0x23d   :  { %v1458_v47 = vpop.eup %1457 }
 0x23e   :  { %v1460_v48 = vpop.eup %1459  ;;  %v489_v50 = vmul.f32 %v1458_v47, %v1456_v46  ;;  %v509_v47 = vld [vmem:[#allocation5 + $0x58] sm:$0xff] }
 0x23f   :  { %v488_v52 = vmul.f32 %v1460_v48, %v373_v49  ;;  %v1462_v56 = vpop.eup %1461 }
 0x241   :  { %v490_v54 = vadd.f32 %v489_v50, %v488_v52 }
 0x243   :  { %1463 = vtanh.f32 %v490_v54  ;;  %v1933_v55 = vsel %vm500_vm10, %v490_v54, %v373_v49  ;;  %v508_v49 = vld [vmem:[#allocation5 + $0x50] sm:$0xff] }
 0x24d   :  { %v1464_v57 = vpop.eup %1463 }
 0x24e   :  { %v492_v58 = vmul.f32 %v1464_v57, %v1462_v56 }
 0x250   :  { %v1938_v60 = vsel %vm500_vm10, %v492_v58, %v374_v59  ;;  %v503_v40 = vsel %vm500_vm10, %v492_v58, 0.0 }
 0x251   :  { %v510_v61 = vpack.c.bf16 %v1938_v60, %v1938_v60  ;;  %v1942_v62 = vadd.f32 %v503_v40, %v374_v59  ;;  %v627_v40 = vpop.permute.xlu1 %626 }
 0x252   :  { %vm628_vm11 = vcmp.eq.s32.totalorder %v627_v40, 1 }
 0x253   :  { %544 = vmatmul.mubr.bf16.vlgmr.msra.gmra.mrb[8].mxu0 %v510_v61  ;;  %585 = vmatmul.mubr.bf16.vlgmr.msra.gmra.mrb[8].mxu1 %v510_v61 }
 0x254   :  { %640 = vmatpush1.bf16.msra.mxu0 %v1729_v2  ;;  %681 = vmatpush1.bf16.msra.mxu1 %v1742_v7 }
 0x255   :  { %641 = vmatprep.subr.bf16.mxu0 %v1732_v3  ;;  %682 = vmatprep.subr.bf16.mxu1 %v1752_v10 }
 0x256   :  { %671 = vmatprep.mubr.bf16.mxu0 %v1671_v0  ;;  %712 = vmatprep.mubr.bf16.mxu1 %v1671_v0 }
 0x258   :  { %642 = vmatpush1.bf16.msra.mxu0 %v1735_v4  ;;  %683 = vmatpush1.bf16.msra.mxu1 %v1754_v11 }
 0x259   :  { %643 = vmatprep.subr.bf16.mxu0 %v1738_v5  ;;  %684 = vmatprep.subr.bf16.mxu1 %v1762_v14 }
 0x25c   :  { %644 = vmatpush1.bf16.msra.mxu0 %v1745_v8  ;;  %685 = vmatpush1.bf16.msra.mxu1 %v1766_v15 }
 0x25d   :  { %645 = vmatprep.subr.bf16.mxu0 %v1749_v9  ;;  %686 = vmatprep.subr.bf16.mxu1 %v1769_v16 }
 0x260   :  { %646 = vmatpush1.bf16.msra.mxu0 %v1758_v12  ;;  %687 = vmatpush1.bf16.msra.mxu1 %v1778_v19 }
 0x261   :  { %647 = vmatprep.subr.bf16.mxu0 %v1760_v13  ;;  %688 = vmatprep.subr.bf16.mxu1 %v1781_v20 }
 0x264   :  { %648 = vmatpush1.bf16.msra.mxu0 %v1772_v17  ;;  %689 = vmatpush1.bf16.msra.mxu1 %v1790_v23 }
 0x265   :  { %649 = vmatprep.subr.bf16.mxu0 %v1775_v18  ;;  %690 = vmatprep.subr.bf16.mxu1 %v1793_v24 }
 0x268   :  { %650 = vmatpush1.bf16.msra.mxu0 %v1784_v21  ;;  %691 = vmatpush1.bf16.msra.mxu1 %v1810_v29 }
 0x269   :  { %651 = vmatprep.subr.bf16.mxu0 %v1786_v22  ;;  %692 = vmatprep.subr.bf16.mxu1 %v1813_v30 }
 0x26c   :  { %652 = vmatpush1.bf16.msra.mxu0 %v1802_v26  ;;  %693 = vmatpush1.bf16.msra.mxu1 %v1822_v33 }
 0x26d   :  { %653 = vmatprep.subr.bf16.mxu0 %v1807_v28  ;;  %694 = vmatprep.subr.bf16.mxu1 %v1825_v34 }
 0x270   :  { %654 = vmatpush1.bf16.msra.mxu0 %v1817_v32  ;;  %695 = vmatpush1.bf16.msra.mxu1 %v1831_v36 }
 0x271   :  { %767 = vmatprep.subr.bf16.mxu0 %v1727_v1  ;;  %808 = vmatprep.subr.bf16.mxu1 %v1740_v6 }
 0x326   :  { %v545_v63 = vpop.f32.mrb[8].mxu0  ;;  %v586_v25 = vpop.f32.mrb[8].mxu1 }
 0x327   :  { %v593_v27 = vadd.f32 %v545_v63, %v506_v43  ;;  %v547_v31 = vpop.f32.mrb[9].mxu0  ;;  %v588_v35 = vpop.f32.mrb[9].mxu1  ;;  %v595_v51 = vadd.f32 %v586_v25, %v508_v49 }
 0x328   :  { %v594_v37 = vadd.f32 %v547_v31, %v507_v44  ;;  %v549_v38 = vpop.f32.mrb[10].mxu0  ;;  %v590_v39 = vpop.f32.mrb[10].mxu1  ;;  %v596_v48 = vadd.f32 %v588_v35, %v509_v47 }
 0x329   :  { %v1344_v41 = vmul.f32 -1.442695, %v593_v27  ;;  %v550_v42 = vpop.f32.mrb[11].mxu0  ;;  %v591_v45 = vpop.f32.mrb[11].mxu1 }
 0x32a   :  { %v1345_v46 = vmul.f32 -1.442695, %v594_v37  ;;  %v1346_v50 = vmul.f32 -1.442695, %v596_v48 }
 0x32b   :  { %1465 = vpow2.f32 %v1344_v41 }
 0x32c   :  { %1467 = vpow2.f32 %v1345_v46 }
 0x32d   :  { %1469 = vpow2.f32 %v1346_v50 }
 0x32e   :  { %1471 = vtanh.f32 %v595_v51 }
 0x335   :  { %v1466_v52 = vpop.eup %1465 }
 0x336   :  { %v1468_v53 = vpop.eup %1467  ;;  %v600_v54 = vadd.f32 1.0, %v1466_v52 }
 0x337   :  { %v606_v56 = vadd.f32 1.0, %v1468_v53  ;;  %v1470_v57 = vpop.eup %1469 }
 0x338   :  { %1473 = vrcp.f32 %v600_v54  ;;  %v1472_v58 = vpop.eup %1471  ;;  %v613_v43 = vadd.f32 1.0, %v1470_v57  ;;  %v637_v57 = vld [vmem:[#allocation5 + $0x78] sm:$0xff] }
 0x339   :  { %1475 = vrcp.f32 %v606_v56 }
 0x33a   :  { %1477 = vrcp.f32 %v613_v43 }
 0x342   :  { %v1474_v59 = vpop.eup %1473 }
 0x343   :  { %v1476_v61 = vpop.eup %1475  ;;  %v617_v44 = vmul.f32 %v1474_v59, %v1472_v58  ;;  %v636_v59 = vld [vmem:[#allocation5 + $0x70] sm:$0xff] }
 0x344   :  { %v616_v63 = vmul.f32 %v1476_v61, %v1933_v55  ;;  %v1478_v31 = vpop.eup %1477 }
 0x346   :  { %v618_v27 = vadd.f32 %v617_v44, %v616_v63 }
 0x348   :  { %1479 = vtanh.f32 %v618_v27  ;;  %v1980_v25 = vsel %vm628_vm11, %v618_v27, %v1933_v55  ;;  %v634_v55 = vld [vmem:[#allocation5 + $0x60] sm:$0xff] }
 0x352   :  { %v1480_v35 = vpop.eup %1479 }
 0x353   :  { %v620_v37 = vmul.f32 %v1480_v35, %v1478_v31 }
 0x355   :  { %v1983_v38 = vsel %vm628_vm11, %v620_v37, %v1938_v60  ;;  %v631_v39 = vsel %vm628_vm11, %v620_v37, 0.0  ;;  %v635_v60 = vld [vmem:[#allocation5 + $0x68] sm:$0xff] }
 0x356   :  { %v1986_v41 = vadd.f32 %v631_v39, %v1942_v62  ;;  %v638_v42 = vpack.c.bf16 %v1983_v38, %v1983_v38 }
 0x358   :  { %672 = vmatmul.mubr.bf16.vlgmr.msra.gmra.mrb[12].mxu0 %v638_v42  ;;  %713 = vmatmul.mubr.bf16.vlgmr.msra.gmra.mrb[12].mxu1 %v638_v42 }
 0x359   :  { %768 = vmatpush1.bf16.msra.mxu0 %v1729_v2  ;;  %809 = vmatpush1.bf16.msra.mxu1 %v1742_v7 }
 0x35a   :  { %769 = vmatprep.subr.bf16.mxu0 %v1732_v3  ;;  %810 = vmatprep.subr.bf16.mxu1 %v1752_v10 }
 0x35b   :  { %799 = vmatprep.mubr.bf16.mxu0 %v1671_v0  ;;  %840 = vmatprep.mubr.bf16.mxu1 %v1671_v0 }
 0x35d   :  { %770 = vmatpush1.bf16.msra.mxu0 %v1735_v4  ;;  %811 = vmatpush1.bf16.msra.mxu1 %v1754_v11 }
 0x35e   :  { %771 = vmatprep.subr.bf16.mxu0 %v1738_v5  ;;  %812 = vmatprep.subr.bf16.mxu1 %v1762_v14 }
 0x361   :  { %772 = vmatpush1.bf16.msra.mxu0 %v1745_v8  ;;  %813 = vmatpush1.bf16.msra.mxu1 %v1766_v15 }
 0x362   :  { %773 = vmatprep.subr.bf16.mxu0 %v1749_v9  ;;  %814 = vmatprep.subr.bf16.mxu1 %v1769_v16 }
 0x365   :  { %774 = vmatpush1.bf16.msra.mxu0 %v1758_v12  ;;  %815 = vmatpush1.bf16.msra.mxu1 %v1778_v19 }
 0x366   :  { %775 = vmatprep.subr.bf16.mxu0 %v1760_v13  ;;  %816 = vmatprep.subr.bf16.mxu1 %v1781_v20 }
 0x369   :  { %776 = vmatpush1.bf16.msra.mxu0 %v1772_v17  ;;  %817 = vmatpush1.bf16.msra.mxu1 %v1790_v23 }
 0x36a   :  { %777 = vmatprep.subr.bf16.mxu0 %v1775_v18  ;;  %818 = vmatprep.subr.bf16.mxu1 %v1793_v24 }
 0x36d   :  { %778 = vmatpush1.bf16.msra.mxu0 %v1784_v21  ;;  %819 = vmatpush1.bf16.msra.mxu1 %v1810_v29 }
 0x36e   :  { %779 = vmatprep.subr.bf16.mxu0 %v1786_v22  ;;  %820 = vmatprep.subr.bf16.mxu1 %v1813_v30 }
 0x371   :  { %780 = vmatpush1.bf16.msra.mxu0 %v1802_v26  ;;  %821 = vmatpush1.bf16.msra.mxu1 %v1822_v33 }
 0x372   :  { %781 = vmatprep.subr.bf16.mxu0 %v1807_v28  ;;  %822 = vmatprep.subr.bf16.mxu1 %v1825_v34 }
 0x375   :  { %782 = vmatpush1.bf16.msra.mxu0 %v1817_v32  ;;  %823 = vmatpush1.bf16.msra.mxu1 %v1831_v36 }
 0x376   :  { %895 = vmatprep.subr.bf16.mxu0 %v1727_v1  ;;  %936 = vmatprep.subr.bf16.mxu1 %v1740_v6 }
 0x42b   :  { %v673_v62 = vpop.f32.mrb[12].mxu0  ;;  %v714_v45 = vpop.f32.mrb[12].mxu1 }
 0x42c   :  { %v721_v46 = vadd.f32 %v673_v62, %v634_v55  ;;  %v675_v47 = vpop.f32.mrb[13].mxu0  ;;  %v716_v48 = vpop.f32.mrb[13].mxu1  ;;  %v723_v61 = vadd.f32 %v714_v45, %v636_v59 }
 0x42d   :  { %v722_v49 = vadd.f32 %v675_v47, %v635_v60  ;;  %v677_v50 = vpop.f32.mrb[14].mxu0  ;;  %v718_v51 = vpop.f32.mrb[14].mxu1  ;;  %v724_v58 = vadd.f32 %v716_v48, %v637_v57 }
 0x42e   :  { %v1348_v52 = vmul.f32 -1.442695, %v721_v46  ;;  %v678_v53 = vpop.f32.mrb[15].mxu0  ;;  %v719_v54 = vpop.f32.mrb[15].mxu1 }
 0x42f   :  { %v1349_v56 = vmul.f32 -1.442695, %v722_v49  ;;  %v1350_v40 = vmul.f32 -1.442695, %v724_v58  ;;  %v755_v62 = vpop.permute.xlu1 %754 }
 0x430   :  { %1481 = vpow2.f32 %v1348_v52  ;;  %vm756_vm12 = vcmp.eq.s32.totalorder %v755_v62, 1 }
 0x431   :  { %1483 = vpow2.f32 %v1349_v56 }
 0x432   :  { %1485 = vpow2.f32 %v1350_v40 }
 0x433   :  { %1487 = vtanh.f32 %v723_v61 }
 0x43a   :  { %v1482_v43 = vpop.eup %1481 }
 0x43b   :  { %v1484_v44 = vpop.eup %1483  ;;  %v728_v63 = vadd.f32 1.0, %v1482_v43 }
 0x43c   :  { %v734_v27 = vadd.f32 1.0, %v1484_v44  ;;  %v1486_v31 = vpop.eup %1485 }
 0x43d   :  { %1489 = vrcp.f32 %v728_v63  ;;  %v1488_v35 = vpop.eup %1487  ;;  %v741_v55 = vadd.f32 1.0, %v1486_v31  ;;  %v883_v63 = vpop.permute.xlu0 %882 }
 0x43e   :  { %1491 = vrcp.f32 %v734_v27  ;;  %vm884_vm13 = vcmp.eq.s32.totalorder %v883_v63, 1 }
 0x43f   :  { %1493 = vrcp.f32 %v741_v55 }
 0x447   :  { %v1490_v37 = vpop.eup %1489 }
 0x448   :  { %v1492_v39 = vpop.eup %1491  ;;  %v745_v42 = vmul.f32 %v1490_v37, %v1488_v35 }
 0x449   :  { %v744_v60 = vmul.f32 %v1492_v39, %v1980_v25  ;;  %v1494_v47 = vpop.eup %1493 }
 0x44b   :  { %v746_v46 = vadd.f32 %v745_v42, %v744_v60 }
 0x44d   :  { %1495 = vtanh.f32 %v746_v46  ;;  %v2026_v45 = vsel %vm756_vm12, %v746_v46, %v1980_v25  ;;  %v2082_v46 = vld [vmem:[#allocation8] ss:$16 sps:$4 sm:$0xff]  }
 0x457   :  { %v1496_v48 = vpop.eup %1495 }
 0x458   :  { %v748_v49 = vmul.f32 %v1496_v48, %v1494_v47  ;;  %v2088_v47 = vld [vmem:[#allocation8 + $0x24] ss:$16 sps:$4 sm:$0xff]   ;;  %v2091_v48 = vld [vmem:[#allocation8 + $0x2c] ss:$16 sps:$4 sm:$0xff]  }
 0x45a   :  { %v2029_v50 = vsel %vm756_vm12, %v748_v49, %v1983_v38  ;;  %v759_v51 = vsel %vm756_vm12, %v748_v49, 0.0  ;;  %v2096_v49 = vld [vmem:[#allocation8 + $0x20] ss:$16 sps:$4 sm:$0xff]  }
 0x45b   :  { %v766_v52 = vpack.c.bf16 %v2029_v50, %v2029_v50  ;;  %v2034_v53 = vadd.f32 %v759_v51, %v1986_v41  ;;  %v2102_v51 = vld [vmem:[#allocation8 + $0x44] ss:$16 sps:$4 sm:$0xff]  }
 0x45d   :  { %800 = vmatmul.mubr.bf16.vlgmr.msra.gmra.mrb[16].mxu0 %v766_v52  ;;  %841 = vmatmul.mubr.bf16.vlgmr.msra.gmra.mrb[16].mxu1 %v766_v52  ;;  %v2105_v52 = vld [vmem:[#allocation8 + $0x4c] ss:$16 sps:$4 sm:$0xff]  }
 0x45e   :  { %896 = vmatpush1.bf16.msra.mxu0 %v1729_v2  ;;  %937 = vmatpush1.bf16.msra.mxu1 %v1742_v7  ;;  %v762_v2 = vld [vmem:[#allocation5 + $0x80] sm:$0xff] }
 0x45f   :  { %897 = vmatprep.subr.bf16.mxu0 %v1732_v3  ;;  %938 = vmatprep.subr.bf16.mxu1 %v1752_v10  ;;  %v763_v3 = vld [vmem:[#allocation5 + $0x88] sm:$0xff] }
 0x460   :  { %927 = vmatprep.mubr.bf16.mxu0 %v1671_v0  ;;  %968 = vmatprep.mubr.bf16.mxu1 %v1671_v0 }
 0x462   :  { %898 = vmatpush1.bf16.msra.mxu0 %v1735_v4  ;;  %939 = vmatpush1.bf16.msra.mxu1 %v1754_v11 }
 0x463   :  { %899 = vmatprep.subr.bf16.mxu0 %v1738_v5  ;;  %940 = vmatprep.subr.bf16.mxu1 %v1762_v14 }
 0x466   :  { %900 = vmatpush1.bf16.msra.mxu0 %v1745_v8  ;;  %941 = vmatpush1.bf16.msra.mxu1 %v1766_v15 }
 0x467   :  { %901 = vmatprep.subr.bf16.mxu0 %v1749_v9  ;;  %942 = vmatprep.subr.bf16.mxu1 %v1769_v16 }
 0x46a   :  { %902 = vmatpush1.bf16.msra.mxu0 %v1758_v12  ;;  %943 = vmatpush1.bf16.msra.mxu1 %v1778_v19 }
 0x46b   :  { %903 = vmatprep.subr.bf16.mxu0 %v1760_v13  ;;  %944 = vmatprep.subr.bf16.mxu1 %v1781_v20 }
 0x46e   :  { %904 = vmatpush1.bf16.msra.mxu0 %v1772_v17  ;;  %945 = vmatpush1.bf16.msra.mxu1 %v1790_v23  ;;  %v765_v17 = vld [vmem:[#allocation5 + $0x98] sm:$0xff] }
 0x46f   :  { %905 = vmatprep.subr.bf16.mxu0 %v1775_v18  ;;  %946 = vmatprep.subr.bf16.mxu1 %v1793_v24  ;;  %v764_v18 = vld [vmem:[#allocation5 + $0x90] sm:$0xff] }
 0x472   :  { %906 = vmatpush1.bf16.msra.mxu0 %v1784_v21  ;;  %947 = vmatpush1.bf16.msra.mxu1 %v1810_v29 }
 0x473   :  { %907 = vmatprep.subr.bf16.mxu0 %v1786_v22  ;;  %948 = vmatprep.subr.bf16.mxu1 %v1813_v30 }
 0x476   :  { %908 = vmatpush1.bf16.msra.mxu0 %v1802_v26  ;;  %949 = vmatpush1.bf16.msra.mxu1 %v1822_v33 }
 0x477   :  { %909 = vmatprep.subr.bf16.mxu0 %v1807_v28  ;;  %950 = vmatprep.subr.bf16.mxu1 %v1825_v34 }
 0x47a   :  { %910 = vmatpush1.bf16.msra.mxu0 %v1817_v32  ;;  %951 = vmatpush1.bf16.msra.mxu1 %v1831_v36 }
 0x47b   :  { %1023 = vmatprep.subr.bf16.mxu0 %v1727_v1  ;;  %1064 = vmatprep.subr.bf16.mxu1 %v1740_v6 }
 0x530   :  { %v801_v4 = vpop.f32.mrb[16].mxu0  ;;  %v842_v5 = vpop.f32.mrb[16].mxu1 }
 0x531   :  { %v849_v7 = vadd.f32 %v801_v4, %v762_v2  ;;  %v803_v8 = vpop.f32.mrb[17].mxu0  ;;  %v844_v9 = vpop.f32.mrb[17].mxu1  ;;  %v851_v25 = vadd.f32 %v842_v5, %v764_v18  ;;  %v2111_v2 = vld [vmem:[#allocation8 + $0x48] ss:$16 sps:$4 sm:$0xff]   ;;  %v2117_v4 = vld [vmem:[#allocation8 + $0x6c] ss:$16 sps:$4 sm:$0xff]  }
 0x532   :  { %v850_v10 = vadd.f32 %v803_v8, %v763_v3  ;;  %v805_v11 = vpop.f32.mrb[18].mxu0  ;;  %v846_v12 = vpop.f32.mrb[18].mxu1  ;;  %v852_v1 = vadd.f32 %v844_v9, %v765_v17  ;;  %v2114_v3 = vld [vmem:[#allocation8 + $0x64] ss:$16 sps:$4 sm:$0xff]   ;;  %v2120_v5 = vld [vmem:[#allocation8 + $0x60] ss:$16 sps:$4 sm:$0xff]  }
 0x533   :  { %v1352_v13 = vmul.f32 -1.442695, %v849_v7  ;;  %v806_v14 = vpop.f32.mrb[19].mxu0  ;;  %v847_v15 = vpop.f32.mrb[19].mxu1  ;;  %v2124_v7 = vld [vmem:[#allocation8 + $0x84] ss:$16 sps:$4 sm:$0xff]  }
 0x534   :  { %v1353_v16 = vmul.f32 -1.442695, %v850_v10  ;;  %v1354_v6 = vmul.f32 -1.442695, %v852_v1  ;;  %v2128_v8 = vld [vmem:[#allocation8 + $0x80] ss:$16 sps:$4 sm:$0xff]  }
 0x535   :  { %1497 = vpow2.f32 %v1352_v13  ;;  %v2132_v9 = vld [vmem:[#allocation8 + $0xa4] ss:$16 sps:$4 sm:$0xff]  }
 0x536   :  { %1499 = vpow2.f32 %v1353_v16  ;;  %v892_v14 = vld [vmem:[#allocation5 + $0xb0] sm:$0xff] }
 0x537   :  { %1501 = vpow2.f32 %v1354_v6 }
 0x538   :  { %1503 = vtanh.f32 %v851_v25 }
 0x53f   :  { %v1498_v38 = vpop.eup %1497 }
 0x540   :  { %v1500_v41 = vpop.eup %1499  ;;  %v856_v54 = vadd.f32 1.0, %v1498_v38 }
 0x541   :  { %v862_v56 = vadd.f32 1.0, %v1500_v41  ;;  %v1502_v57 = vpop.eup %1501 }
 0x542   :  { %1505 = vrcp.f32 %v856_v54  ;;  %v1504_v58 = vpop.eup %1503  ;;  %v869_v43 = vadd.f32 1.0, %v1502_v57 }
 0x543   :  { %1507 = vrcp.f32 %v862_v56 }
 0x544   :  { %1509 = vrcp.f32 %v869_v43 }
 0x54c   :  { %v1506_v59 = vpop.eup %1505 }
 0x54d   :  { %v1508_v40 = vpop.eup %1507  ;;  %v873_v61 = vmul.f32 %v1506_v59, %v1504_v58  ;;  %v1011_v59 = vpop.permute.xlu1 %1010 }
 0x54e   :  { %v872_v44 = vmul.f32 %v1508_v40, %v2026_v45  ;;  %v1510_v35 = vpop.eup %1509  ;;  %vm1012_vm14 = vcmp.eq.s32.totalorder %v1011_v59, 1  ;;  %v1146_v59 = vld [vmem:[#allocation5 + $0xe0] sm:$0xff] }
 0x550   :  { %v874_v27 = vadd.f32 %v873_v61, %v872_v44 }
 0x552   :  { %1511 = vtanh.f32 %v874_v27  ;;  %v2072_v31 = vsel %vm884_vm13, %v874_v27, %v2026_v45  ;;  %v2085_v45 = vld [vmem:[#allocation8 + $0x8] ss:$16 sps:$4 sm:$0xff]  }
 0x55c   :  { %v1512_v37 = vpop.eup %1511 }
 0x55d   :  { %v876_v39 = vmul.f32 %v1512_v37, %v1510_v35 }
 0x55f   :  { %v2075_v42 = vsel %vm884_vm13, %v876_v39, %v2029_v50  ;;  %v887_v55 = vsel %vm884_vm13, %v876_v39, 0.0  ;;  %v2099_v50 = vld [vmem:[#allocation8 + $0x28] ss:$16 sps:$4 sm:$0xff]  }
 0x560   :  { %v894_v60 = vpack.c.bf16 %v2075_v42, %v2075_v42  ;;  %v2080_v62 = vadd.f32 %v887_v55, %v2034_v53  ;;  %v2108_v53 = vld [vmem:[#allocation8 + $0x40] ss:$16 sps:$4 sm:$0xff]   ;;  %v1582_v55 = vld [vmem:[#allocation8 + $0xac] ss:$16 sps:$4 sm:$0xff]  }
 0x562   :  { %928 = vmatmul.mubr.bf16.vlgmr.msra.gmra.mrb[20].mxu0 %v894_v60  ;;  %969 = vmatmul.mubr.bf16.vlgmr.msra.gmra.mrb[20].mxu1 %v894_v60  ;;  %v1583_v60 = vld [vmem:[#allocation8 + $0xa0] ss:$16 sps:$4 sm:$0xff]  }
 0x563   :  { %1024 = vmatpush1.bf16.msra.mxu0 %v2082_v46  ;;  %1065 = vmatpush1.bf16.msra.mxu1 %v2085_v45 }
 0x564   :  { %1025 = vmatprep.subr.bf16.mxu0 %v2088_v47  ;;  %1066 = vmatprep.subr.bf16.mxu1 %v2091_v48 }
 0x565   :  { %1055 = vmatprep.mubr.bf16.mxu0 %v1671_v0  ;;  %1096 = vmatprep.mubr.bf16.mxu1 %v1671_v0 }
 0x567   :  { %1026 = vmatpush1.bf16.msra.mxu0 %v2096_v49  ;;  %1067 = vmatpush1.bf16.msra.mxu1 %v2099_v50 }
 0x568   :  { %1027 = vmatprep.subr.bf16.mxu0 %v2102_v51  ;;  %1068 = vmatprep.subr.bf16.mxu1 %v2105_v52 }
 0x56b   :  { %1028 = vmatpush1.bf16.msra.mxu0 %v2108_v53  ;;  %1069 = vmatpush1.bf16.msra.mxu1 %v2111_v2 }
 0x56c   :  { %1029 = vmatprep.subr.bf16.mxu0 %v2114_v3  ;;  %1070 = vmatprep.subr.bf16.mxu1 %v2117_v4 }
 0x56f   :  { %1030 = vmatpush1.bf16.msra.mxu0 %v2120_v5  ;;  %1071 = vmatpush1.bf16.msra.mxu1 %v1778_v19  ;;  %v1577_v19 = vld [vmem:[#allocation8 + $0x4] ss:$16 sps:$4 sm:$0xff]  }
 0x570   :  { %1031 = vmatprep.subr.bf16.mxu0 %v2124_v7  ;;  %1072 = vmatprep.subr.bf16.mxu1 %v1781_v20  ;;  %v1578_v20 = vld [vmem:[#allocation8 + $0xc] ss:$16 sps:$4 sm:$0xff]  }
 0x573   :  { %1032 = vmatpush1.bf16.msra.mxu0 %v2128_v8  ;;  %1073 = vmatpush1.bf16.msra.mxu1 %v1790_v23 }
 0x574   :  { %1033 = vmatprep.subr.bf16.mxu0 %v2132_v9  ;;  %1074 = vmatprep.subr.bf16.mxu1 %v1793_v24 }
 0x577   :  { %1034 = vmatpush1.bf16.msra.mxu0 %v1784_v21  ;;  %1075 = vmatpush1.bf16.msra.mxu1 %v1810_v29  ;;  %v890_v21 = vld [vmem:[#allocation5 + $0xa0] sm:$0xff] }
 0x578   :  { %1035 = vmatprep.subr.bf16.mxu0 %v1786_v22  ;;  %1076 = vmatprep.subr.bf16.mxu1 %v1813_v30  ;;  %v891_v22 = vld [vmem:[#allocation5 + $0xa8] sm:$0xff] }
 0x57b   :  { %1036 = vmatpush1.bf16.msra.mxu0 %v1802_v26  ;;  %1077 = vmatpush1.bf16.msra.mxu1 %v1822_v33 }
 0x57c   :  { %1037 = vmatprep.subr.bf16.mxu0 %v1807_v28  ;;  %1078 = vmatprep.subr.bf16.mxu1 %v1825_v34 }
 0x57f   :  { %1038 = vmatpush1.bf16.msra.mxu0 %v1817_v32  ;;  %1079 = vmatpush1.bf16.msra.mxu1 %v1831_v36  ;;  %v893_v36 = vld [vmem:[#allocation5 + $0xb8] sm:$0xff] }
 0x580   :  { %1151 = vmatprep.subr.bf16.mxu0 %v1577_v19  ;;  %1192 = vmatprep.subr.bf16.mxu1 %v1578_v20 }
 0x635   :  { %v929_v23 = vpop.f32.mrb[20].mxu0  ;;  %v970_v24 = vpop.f32.mrb[20].mxu1 }
 0x636   :  { %v977_v29 = vadd.f32 %v929_v23, %v890_v21  ;;  %v931_v26 = vpop.f32.mrb[21].mxu0  ;;  %v972_v30 = vpop.f32.mrb[21].mxu1  ;;  %v979_v16 = vadd.f32 %v970_v24, %v892_v14 }
 0x637   :  { %v978_v33 = vadd.f32 %v931_v26, %v891_v22  ;;  %v933_v10 = vpop.f32.mrb[22].mxu0  ;;  %v974_v28 = vpop.f32.mrb[22].mxu1  ;;  %v980_v13 = vadd.f32 %v972_v30, %v893_v36  ;;  %v1020_v30 = vld [vmem:[#allocation5 + $0xd0] sm:$0xff] }
 0x638   :  { %v1356_v11 = vmul.f32 -1.442695, %v977_v29  ;;  %v934_v34 = vpop.f32.mrb[23].mxu0  ;;  %v975_v12 = vpop.f32.mrb[23].mxu1  ;;  %v1021_v29 = vld [vmem:[#allocation5 + $0xd8] sm:$0xff] }
 0x639   :  { %v1357_v32 = vmul.f32 -1.442695, %v978_v33  ;;  %v1358_v15 = vmul.f32 -1.442695, %v980_v13 }
 0x63a   :  { %1513 = vpow2.f32 %v1356_v11 }
 0x63b   :  { %1515 = vpow2.f32 %v1357_v32 }
 0x63c   :  { %1517 = vpow2.f32 %v1358_v15 }
 0x63d   :  { %1519 = vtanh.f32 %v979_v16 }
 0x644   :  { %v1514_v17 = vpop.eup %1513 }
 0x645   :  { %v1516_v1 = vpop.eup %1515  ;;  %v984_v18 = vadd.f32 1.0, %v1514_v17 }
 0x646   :  { %v990_v6 = vadd.f32 1.0, %v1516_v1  ;;  %v1518_v25 = vpop.eup %1517  ;;  %v1139_v1 = vpop.permute.xlu0 %1138 }
 0x647   :  { %1521 = vrcp.f32 %v984_v18  ;;  %v1520_v38 = vpop.eup %1519  ;;  %v997_v57 = vadd.f32 1.0, %v1518_v25  ;;  %vm1140_vm15 = vcmp.eq.s32.totalorder %v1139_v1, 1 }
 0x648   :  { %1523 = vrcp.f32 %v990_v6 }
 0x649   :  { %1525 = vrcp.f32 %v997_v57 }
 0x651   :  { %v1522_v41 = vpop.eup %1521 }
 0x652   :  { %v1524_v54 = vpop.eup %1523  ;;  %v1001_v56 = vmul.f32 %v1522_v41, %v1520_v38 }
 0x653   :  { %v1000_v58 = vmul.f32 %v1524_v54, %v2072_v31  ;;  %v1526_v43 = vpop.eup %1525 }
 0x655   :  { %v1002_v40 = vadd.f32 %v1001_v56, %v1000_v58 }
 0x657   :  { %1527 = vtanh.f32 %v1002_v40  ;;  %v2148_v61 = vsel %vm1012_vm14, %v1002_v40, %v2072_v31  ;;  %v1579_v31 = vld [vmem:[#allocation8 + $0x68] ss:$16 sps:$4 sm:$0xff]  }
 0x658   :  { %v1147_v40 = vld [vmem:[#allocation5 + $0xe8] sm:$0xff] }
 0x661   :  { %v1528_v44 = vpop.eup %1527 }
 0x662   :  { %v1004_v63 = vmul.f32 %v1528_v44, %v1526_v43 }
 0x664   :  { %v2151_v27 = vsel %vm1012_vm14, %v1004_v63, %v2075_v42  ;;  %v1015_v35 = vsel %vm1012_vm14, %v1004_v63, 0.0  ;;  %v1581_v42 = vld [vmem:[#allocation8 + $0x88] ss:$16 sps:$4 sm:$0xff]  }
 0x665   :  { %v1022_v37 = vpack.c.bf16 %v2151_v27, %v2151_v27  ;;  %v2156_v39 = vadd.f32 %v1015_v35, %v2080_v62  ;;  %v1584_v62 = vld [vmem:[#allocation8 + $0xa8] ss:$16 sps:$4 sm:$0xff]  }
 0x667   :  { %1056 = vmatmul.mubr.bf16.vlgmr.msra.gmra.mrb[24].mxu0 %v1022_v37  ;;  %1097 = vmatmul.mubr.bf16.vlgmr.msra.gmra.mrb[24].mxu1 %v1022_v37 }
 0x668   :  { %1152 = vmatpush1.bf16.msra.mxu0 %v2082_v46  ;;  %1193 = vmatpush1.bf16.msra.mxu1 %v2085_v45  ;;  %v1585_v46 = vld [vmem:[#allocation8 + $0xc4] ss:$16 sps:$4 sm:$0xff]   ;;  %v1586_v45 = vld [vmem:[#allocation8 + $0xcc] ss:$16 sps:$4 sm:$0xff]  }
 0x669   :  { %1153 = vmatprep.subr.bf16.mxu0 %v2088_v47  ;;  %1194 = vmatprep.subr.bf16.mxu1 %v2091_v48  ;;  %v1587_v47 = vld [vmem:[#allocation8 + $0xc0] ss:$16 sps:$4 sm:$0xff]   ;;  %v1588_v48 = vld [vmem:[#allocation8 + $0xc8] ss:$16 sps:$4 sm:$0xff]  }
 0x66a   :  { %1183 = vmatprep.mubr.bf16.mxu0 %v1671_v0  ;;  %1224 = vmatprep.mubr.bf16.mxu1 %v1671_v0  ;;  %v1580_v0 = vld [vmem:[#allocation8 + $0x8c] ss:$16 sps:$4 sm:$0xff]  }
 0x66c   :  { %1154 = vmatpush1.bf16.msra.mxu0 %v2096_v49  ;;  %1195 = vmatpush1.bf16.msra.mxu1 %v2099_v50  ;;  %v1589_v49 = vld [vmem:[#allocation8 + $0xe4] ss:$16 sps:$4 sm:$0xff]   ;;  %v1590_v50 = vld [vmem:[#allocation8 + $0xec] ss:$16 sps:$4 sm:$0xff]  }
 0x66d   :  { %1155 = vmatprep.subr.bf16.mxu0 %v2102_v51  ;;  %1196 = vmatprep.subr.bf16.mxu1 %v2105_v52  ;;  %v1591_v51 = vld [vmem:[#allocation8 + $0xe0] ss:$16 sps:$4 sm:$0xff]   ;;  %v1592_v52 = vld [vmem:[#allocation8 + $0xe8] ss:$16 sps:$4 sm:$0xff]  }
 0x670   :  { %1156 = vmatpush1.bf16.msra.mxu0 %v2108_v53  ;;  %1197 = vmatpush1.bf16.msra.mxu1 %v2111_v2  ;;  %v1018_v53 = vld [vmem:[#allocation5 + $0xc0] sm:$0xff]  ;;  %v1019_v2 = vld [vmem:[#allocation5 + $0xc8] sm:$0xff] }
 0x671   :  { %1157 = vmatprep.subr.bf16.mxu0 %v2114_v3  ;;  %1198 = vmatprep.subr.bf16.mxu1 %v2117_v4 }
 0x674   :  { %1158 = vmatpush1.bf16.msra.mxu0 %v2120_v5  ;;  %1199 = vmatpush1.bf16.msra.mxu1 %v1579_v31 }
 0x675   :  { %1159 = vmatprep.subr.bf16.mxu0 %v2124_v7  ;;  %1200 = vmatprep.subr.bf16.mxu1 %v1580_v0 }
 0x678   :  { %1160 = vmatpush1.bf16.msra.mxu0 %v2128_v8  ;;  %1201 = vmatpush1.bf16.msra.mxu1 %v1581_v42 }
 0x679   :  { %1161 = vmatprep.subr.bf16.mxu0 %v2132_v9  ;;  %1202 = vmatprep.subr.bf16.mxu1 %v1582_v55 }
 0x67c   :  { %1162 = vmatpush1.bf16.msra.mxu0 %v1583_v60  ;;  %1203 = vmatpush1.bf16.msra.mxu1 %v1584_v62  ;;  %v1149_v62 = vld [vmem:[#allocation5 + $0xf8] sm:$0xff] }
 0x67d   :  { %1163 = vmatprep.subr.bf16.mxu0 %v1585_v46  ;;  %1204 = vmatprep.subr.bf16.mxu1 %v1586_v45  ;;  %v1148_v46 = vld [vmem:[#allocation5 + $0xf0] sm:$0xff] }
 0x680   :  { %1164 = vmatpush1.bf16.msra.mxu0 %v1587_v47  ;;  %1205 = vmatpush1.bf16.msra.mxu1 %v1588_v48 }
 0x681   :  { %1165 = vmatprep.subr.bf16.mxu0 %v1589_v49  ;;  %1206 = vmatprep.subr.bf16.mxu1 %v1590_v50 }
 0x684   :  { %1166 = vmatpush1.bf16.msra.mxu0 %v1591_v51  ;;  %1207 = vmatpush1.bf16.msra.mxu1 %v1592_v52 }
 0x73a   :  { %v1057_v3 = vpop.f32.mrb[24].mxu0  ;;  %v1098_v4 = vpop.f32.mrb[24].mxu1 }
 0x73b   :  { %v1105_v5 = vadd.f32 %v1057_v3, %v1018_v53  ;;  %v1059_v7 = vpop.f32.mrb[25].mxu0  ;;  %v1100_v8 = vpop.f32.mrb[25].mxu1  ;;  %v1107_v10 = vadd.f32 %v1098_v4, %v1020_v30 }
 0x73c   :  { %v1106_v9 = vadd.f32 %v1059_v7, %v1019_v2  ;;  %v1061_v19 = vpop.f32.mrb[26].mxu0  ;;  %v1102_v20 = vpop.f32.mrb[26].mxu1  ;;  %v1108_v26 = vadd.f32 %v1100_v8, %v1021_v29 }
 0x73d   :  { %v1360_v21 = vmul.f32 -1.442695, %v1105_v5  ;;  %v1062_v22 = vpop.f32.mrb[27].mxu0  ;;  %v1103_v23 = vpop.f32.mrb[27].mxu1 }
 0x73e   :  { %v1361_v24 = vmul.f32 -1.442695, %v1106_v9  ;;  %v1362_v33 = vmul.f32 -1.442695, %v1108_v26  ;;  %v1267_v19 = vpop.permute.xlu1 %1266 }
 0x73f   :  { %1529 = vpow2.f32 %v1360_v21  ;;  %vm1268_vm0 = vcmp.eq.s32.totalorder %v1267_v19, 1 }
 0x740   :  { %1531 = vpow2.f32 %v1361_v24  ;;  %v1284_v24 = vpop.permute.xlu0 %1283 }
 0x741   :  { %1533 = vpow2.f32 %v1362_v33 }
 0x742   :  { %1535 = vtanh.f32 %v1107_v10 }
 0x749   :  { %v1530_v28 = vpop.eup %1529 }
 0x74a   :  { %v1532_v11 = vpop.eup %1531  ;;  %v1112_v34 = vadd.f32 1.0, %v1530_v28 }
 0x74b   :  { %v1118_v12 = vadd.f32 1.0, %v1532_v11  ;;  %v1534_v32 = vpop.eup %1533 }
 0x74c   :  { %1537 = vrcp.f32 %v1112_v34  ;;  %v1536_v36 = vpop.eup %1535  ;;  %v1125_v16 = vadd.f32 1.0, %v1534_v32 }
 0x74d   :  { %1539 = vrcp.f32 %v1118_v12 }
 0x74e   :  { %1541 = vrcp.f32 %v1125_v16 }
 0x756   :  { %v1538_v13 = vpop.eup %1537 }
 0x757   :  { %v1540_v14 = vpop.eup %1539  ;;  %v1129_v15 = vmul.f32 %v1538_v13, %v1536_v36 }
 0x758   :  { %v1128_v17 = vmul.f32 %v1540_v14, %v2148_v61  ;;  %v1542_v25 = vpop.eup %1541 }
 0x75a   :  { %v1130_v18 = vadd.f32 %v1129_v15, %v1128_v17 }
 0x75c   :  { %1543 = vtanh.f32 %v1130_v18  ;;  %v1141_v6 = vsel %vm1140_vm15, %v1130_v18, %v2148_v61 }
 0x766   :  { %v1544_v38 = vpop.eup %1543 }
 0x767   :  { %v1132_v41 = vmul.f32 %v1544_v38, %v1542_v25 }
 0x769   :  { %v1142_v54 = vsel %vm1140_vm15, %v1132_v41, %v2151_v27  ;;  %v1143_v56 = vsel %vm1140_vm15, %v1132_v41, 0.0 }
 0x76a   :  { %v1150_v57 = vpack.c.bf16 %v1142_v54, %v1142_v54  ;;  %v1144_v58 = vadd.f32 %v1143_v56, %v2156_v39 }
 0x76c   :  { %1184 = vmatmul.mubr.bf16.vlgmr.msra.gmra.mrb[28].mxu0 %v1150_v57  ;;  %1225 = vmatmul.mubr.bf16.vlgmr.msra.gmra.mrb[28].mxu1 %v1150_v57 }
 0x83f   :  { %v1185_v43 = vpop.f32.mrb[28].mxu0  ;;  %v1226_v44 = vpop.f32.mrb[28].mxu1 }
 0x840   :  { %v1233_v63 = vadd.f32 %v1185_v43, %v1146_v59  ;;  %v1187_v35 = vpop.f32.mrb[29].mxu0  ;;  %v1228_v37 = vpop.f32.mrb[29].mxu1  ;;  %v1235_v47 = vadd.f32 %v1226_v44, %v1148_v46 }
 0x841   :  { %v1234_v31 = vadd.f32 %v1187_v35, %v1147_v40  ;;  %v1189_v61 = vpop.f32.mrb[30].mxu0  ;;  %v1230_v0 = vpop.f32.mrb[30].mxu1  ;;  %v1236_v39 = vadd.f32 %v1228_v37, %v1149_v62 }
 0x842   :  { %v1364_v42 = vmul.f32 -1.442695, %v1233_v63  ;;  %v1190_v55 = vpop.f32.mrb[31].mxu0  ;;  %v1231_v60 = vpop.f32.mrb[31].mxu1 }
 0x843   :  { %v1365_v27 = vmul.f32 -1.442695, %v1234_v31  ;;  %v1366_v45 = vmul.f32 -1.442695, %v1236_v39 }
 0x844   :  { %1545 = vpow2.f32 %v1364_v42 }
 0x845   :  { %1547 = vpow2.f32 %v1365_v27 }
 0x846   :  { %1549 = vpow2.f32 %v1366_v45 }
 0x847   :  { %1551 = vtanh.f32 %v1235_v47 }
 0x84e   :  { %v1546_v48 = vpop.eup %1545 }
 0x84f   :  { %v1548_v49 = vpop.eup %1547  ;;  %v1240_v50 = vadd.f32 1.0, %v1546_v48 }
 0x850   :  { %v1246_v51 = vadd.f32 1.0, %v1548_v49  ;;  %v1550_v52 = vpop.eup %1549 }
 0x851   :  { %1553 = vrcp.f32 %v1240_v50  ;;  %v1552_v53 = vpop.eup %1551  ;;  %v1253_v5 = vadd.f32 1.0, %v1550_v52 }
 0x852   :  { %1555 = vrcp.f32 %v1246_v51 }
 0x853   :  { %1557 = vrcp.f32 %v1253_v5 }
 0x85b   :  { %v1554_v2 = vpop.eup %1553 }
 0x85c   :  { %v1556_v3 = vpop.eup %1555  ;;  %v1257_v4 = vmul.f32 %v1554_v2, %v1552_v53 }
 0x85d   :  { %v1256_v7 = vmul.f32 %v1556_v3, %v1141_v6  ;;  %v1558_v9 = vpop.eup %1557 }
 0x85f   :  { %v1258_v8 = vadd.f32 %v1257_v4, %v1256_v7 }
 0x861   :  { %1559 = vtanh.f32 %v1258_v8 }
 0x86b   :  { %v1560_v20 = vpop.eup %1559 }
 0x86c   :  { %v1260_v21 = vmul.f32 %v1560_v20, %v1558_v9 }
 0x86e   :  { %v1271_v22 = vsel %vm1268_vm0, %v1260_v21, 0.0 }
 0x86f   :  { %v1272_v23 = vadd.f32 %v1271_v22, %v1144_v58 }
 0x871   :  { %v1286_v29 = vmul.f32 %v1284_v24, %v1272_v23 }
 0x873   :  { %1287 = vst [vmem:[#allocation10] sm:$0xff] %v1286_v29 }
 0x874   :  { %1648 = shalt.err (!%p1645_p6)
}
 0x875   :  { %s1649_s22 = scalar_lea.hbm %s2196_s4, 128 }
 0x876   :  { %p1650_p7 = scmp.ne.s32.totalorder %s2196_s4, %s1649_s22  ;;  %p1653_p8 = scmp.lt.u32.totalorder %s1649_s22, %s2196_s4 }
 0x878   :  { %p1655_p9 = pnand %p1653_p8, %p1650_p7 }
 0x87a   :  { %1658 = shalt.err (!%p1655_p9)
}
 0x87b   :  { %1297 = dma.vmem_to_hbm [thread:$0]  %s1295_s18, 128, %s2196_s4, [#allocation7]  }
 0x87c   :  { %1663 = dma.done.wait [#allocation7], 128  }
 0x87d   :  { %1664 = vsyncadd [#allocation7], 4294967168 }
 0x87e   :  { %1301 = vsyncpa [#allocation6], 1 }
 0x87f   :  { %1302 = vsyncpa [#allocation9], 1 }
 0x880   :  { %1303 = vsyncpa [#allocation7], 1 }

</bundles_post_ra>
